<compile_context>
chip_gen: v6e
topology: v6e:2x2x1
jax: 0.10.0
libtpu: 0.0.40
codegen_flags: <defaults>
</compile_context>

<pallas_src>
import numpy as np
import jax
import jax.numpy as jnp
from jax import lax
from jax.experimental import pallas as pl
from jax.experimental.pallas import tpu as pltpu


def _round_up(x, m):
    return ((x + m - 1) // m) * m


# ----------------------------------------------------------------------------
# Pallas kernel: fused actor+critic LSTM recurrence + fused output heads
# ----------------------------------------------------------------------------
def make_lstm_ac_kernel(T, B):
    """Build the kernel (T, B are static Python ints captured by closure).

    Layouts (all f32, packed in the wrapper):
      obs_ref   : (T*B, D)   time-major, row index = t*B + b
      wih_ref   : (D,  4*P)  combined input->gate weights; each P-wide band k
                             holds [gate_k_actor(H) | gate_k_critic(H) | 0],
                             k in (i, f, g, o)  (PyTorch gate order)
      whh_ref   : (P,  4*P)  block-diagonal recurrent weights; rows 0:H actor,
                             rows H:2H critic, rows 2H:P zero
      b_ref     : (1,  4*P)  folded b_ih + b_hh for both LSTMs
      whead_ref : (P,  NP)   fused [pi_mu | pi_tril | v] head weights
      bhead_ref : (1,  NP)
      out_ref   : (B,  NP)   [mu(A) | tril(Tr) | v(1) | 0...]
    where P = 2H rounded up to a multiple of 128 (>= 128).
    """

    def kernel(obs_ref, wih_ref, whh_ref, b_ref, whead_ref, bhead_ref, out_ref):
        P = whh_ref.shape[0]                      # padded [actor|critic] width

        # ---- hoisted input projection: one MXU pass for all T steps, both
        # LSTMs, bias folded in (nothing of this is on the serial chain) ----
        gx = (jnp.dot(obs_ref[...], wih_ref[...],
                      preferred_element_type=jnp.float32)
              + b_ref[...])                        # (T*B, 4P)

        whh = whh_ref[...]                         # (P, 4P), read once

        # ---- fused actor+critic recurrence, fully unrolled ----
        h = jnp.zeros((B, P), jnp.float32)         # [h_actor | h_critic | 0]
        c = jnp.zeros((B, P), jnp.float32)         # [c_actor | c_critic | 0]
        for t in range(T):                         # T static -> full unroll
            gates = gx[t * B:(t + 1) * B, :] + jnp.dot(
                h, whh, preferred_element_type=jnp.float32)   # (B, 4P)
            # Gate bands are 128-lane aligned -> full-vreg slices.
            i_g = jax.nn.sigmoid(gates[:, 0 * P:1 * P])
            f_g = jax.nn.sigmoid(gates[:, 1 * P:2 * P])
            g_g = jnp.tanh(gates[:, 2 * P:3 * P])
            o_g = jax.nn.sigmoid(gates[:, 3 * P:4 * P])
            c = f_g * c + i_g * g_g
            h = o_g * jnp.tanh(c)
            # Padding lanes stay exactly zero (zero weights/bias in pad cols).

        # ---- all three heads fused: one matmul, one lane-dense store ----
        out_ref[...] = (jnp.dot(h, whead_ref[...],
                                preferred_element_type=jnp.float32)
                        + bhead_ref[...])

    return kernel


# ----------------------------------------------------------------------------
# Wrapper: parameter packing, pallas_call, covariance construction (glue)
# ----------------------------------------------------------------------------
def lstm_actor_critic_forward(obs, params, act_dim):
    """obs: (B, T, obs_dim) float32 (batch_first, like the PyTorch module).

    Uses zero initial hidden/cell state (fresh-batch / reset semantics of the
    module's forward).
    """
    if obs.ndim == 1:
        obs = obs[None, :]
    if obs.ndim == 2:
        obs = obs[:, None, :]
    obs = obs.astype(jnp.float32)
    B, T, D = obs.shape
    H = params["whh_a"].shape[1]
    A = act_dim
    Tr = A * (A + 1) // 2

    P = max(128, _round_up(2 * H, 128))       # padded [actor|critic] hidden
    NOUT = A + Tr + 1
    NP = max(128, _round_up(NOUT, 128))       # lane-dense head output width

    # ---------------- parameter packing (one-time glue, plain JAX) ----------
    def pack_bands(dst, src_a, src_c):
        # per gate band k: [actor cols (H) | critic cols (H) | zeros]
        for gi in range(4):
            dst = dst.at[:, gi * P:gi * P + H].set(src_a[:, gi * H:(gi + 1) * H])
            dst = dst.at[:, gi * P + H:gi * P + 2 * H].set(
                src_c[:, gi * H:(gi + 1) * H])
        return dst

    wih = pack_bands(jnp.zeros((D, 4 * P), jnp.float32),
                     params["wih_a"].T, params["wih_c"].T)       # (D, 4P)

    whh = jnp.zeros((P, 4 * P), jnp.float32)                      # block-diag
    whh_aT = params["whh_a"].T                                    # (H, 4H)
    whh_cT = params["whh_c"].T
    for gi in range(4):
        whh = whh.at[0:H, gi * P:gi * P + H].set(whh_aT[:, gi * H:(gi + 1) * H])
        whh = whh.at[H:2 * H, gi * P + H:gi * P + 2 * H].set(
            whh_cT[:, gi * H:(gi + 1) * H])

    b_a = (params["bih_a"] + params["bhh_a"]).reshape(1, 4 * H)
    b_c = (params["bih_c"] + params["bhh_c"]).reshape(1, 4 * H)
    bias = pack_bands(jnp.zeros((1, 4 * P), jnp.float32), b_a, b_c)  # (1, 4P)

    w_heads = jnp.zeros((P, NP), jnp.float32)
    w_heads = w_heads.at[0:H, 0:A].set(params["w_mu"].T)
    w_heads = w_heads.at[0:H, A:A + Tr].set(params["w_tril"].T)
    w_heads = w_heads.at[H:2 * H, A + Tr:A + Tr + 1].set(params["w_v"].T)
    b_heads = jnp.zeros((1, NP), jnp.float32)
    b_heads = b_heads.at[0, 0:A].set(params["b_mu"])
    b_heads = b_heads.at[0, A:A + Tr].set(params["b_tril"])
    b_heads = b_heads.at[0, A + Tr].set(params["b_v"][0])

    # time-major flatten: row index = t * B + b
    obs_tm = jnp.transpose(obs, (1, 0, 2)).reshape(T * B, D)

    # ---------------- pallas_call (gridless, whole-array VMEM resident) -----
    # TODO(synk): on v7x the two independent LSTMs could instead be split
    # across the two TensorCores (grid=(2,), "parallel"); here they are fused
    # into one chain, which is the portable win on v5e/v6e/v7x.
    vmem = pl.BlockSpec(memory_space=pltpu.MemorySpace.VMEM)
    out = pl.pallas_call(
        make_lstm_ac_kernel(T, B),
        out_shape=jax.ShapeDtypeStruct((B, NP), jnp.float32),
        in_specs=[vmem] * 6,
        out_specs=vmem,
    )(obs_tm, wih, whh, bias, w_heads, b_heads)

    mu = out[:, 0:A]
    tril_elements = out[:, A:A + Tr]
    v = out[:, A + Tr]

    # ---- covariance construction (glue; tiny A x A, stays in plain JAX) ----
    # TODO(synk): tril scatter + per-element diag clamp has no clean Pallas
    # equivalent at this size; done in JAX here.
    idx = jnp.tril_indices(A)
    L = jnp.zeros((B, A, A), jnp.float32).at[:, idx[0], idx[1]].set(tril_elements)
    diag_r = jnp.arange(A)
    L = L.at[:, diag_r, diag_r].add(1e-6)
    cov = L @ jnp.swapaxes(L, -1, -2)
    diag = jnp.clip(cov[:, diag_r, diag_r], 1e-6, 10.0)
    cov = cov.at[:, diag_r, diag_r].set(diag)

    return mu, cov, v


# ----------------------------------------------------------------------------
# Pure-JAX reference (for a correctness sanity check)
# ----------------------------------------------------------------------------
def _ref_forward(obs, params, act_dim):
    B, T, D = obs.shape
    H = params["whh_a"].shape[1]
    A = act_dim

    def run_lstm(wih, whh, bih, bhh):
        h = jnp.zeros((B, H), jnp.float32)
        c = jnp.zeros((B, H), jnp.float32)
        for t in range(T):
            g = obs[:, t, :] @ wih.T + bih + h @ whh.T + bhh
            i_g = jax.nn.sigmoid(g[:, 0:H])
            f_g = jax.nn.sigmoid(g[:, H:2 * H])
            g_g = jnp.tanh(g[:, 2 * H:3 * H])
            o_g = jax.nn.sigmoid(g[:, 3 * H:4 * H])
            c = f_g * c + i_g * g_g
            h = o_g * jnp.tanh(c)
        return h

    h_a = run_lstm(params["wih_a"], params["whh_a"], params["bih_a"], params["bhh_a"])
    h_c = run_lstm(params["wih_c"], params["whh_c"], params["bih_c"], params["bhh_c"])
    mu = h_a @ params["w_mu"].T + params["b_mu"]
    tril = h_a @ params["w_tril"].T + params["b_tril"]
    v = (h_c @ params["w_v"].T + params["b_v"])[:, 0]

    idx = jnp.tril_indices(A)
    L = jnp.zeros((B, A, A), jnp.float32).at[:, idx[0], idx[1]].set(tril)
    r = jnp.arange(A)
    L = L.at[:, r, r].add(1e-6)
    cov = L @ jnp.swapaxes(L, -1, -2)
    d = jnp.clip(cov[:, r, r], 1e-6, 10.0)
    cov = cov.at[:, r, r].set(d)
    return mu, cov, v


# ----------------------------------------------------------------------------
# Deterministic parameter construction (mirrors the module's __init__ shapes)
# ----------------------------------------------------------------------------
def make_params(key, obs_dim, act_dim, hidden_size):
    H, D, A = hidden_size, obs_dim, act_dim
    Tr = A * (A + 1) // 2
    bound = 1.0 / np.sqrt(H)
    ks = jax.random.split(key, 12)
    u = lambda k, shape: jax.random.uniform(
        k, shape, jnp.float32, minval=-bound, maxval=bound)

    b_tril = np.zeros((Tr,), np.float32)
    for i in range(A):
        j = int(i * (i + 1) / 2 + i)
        if j < Tr:
            b_tril[j] = -0.5

    return {
        "wih_a": u(ks[0], (4 * H, D)), "whh_a": u(ks[1], (4 * H, H)),
        "bih_a": u(ks[2], (4 * H,)),   "bhh_a": u(ks[3], (4 * H,)),
        "wih_c": u(ks[4], (4 * H, D)), "whh_c": u(ks[5], (4 * H, H)),
        "bih_c": u(ks[6], (4 * H,)),   "bhh_c": u(ks[7], (4 * H,)),
        "w_mu": u(ks[8], (A, H)),      "b_mu": u(ks[9], (A,)),
        "w_tril": jnp.zeros((Tr, H), jnp.float32),
        "b_tril": jnp.asarray(b_tril),
        "w_v": u(ks[10], (1, H)),      "b_v": u(ks[11], (1,)),
    }


if __name__ == "__main__":
    obs_dim, act_dim, hidden_size = 16, 4, 32
    batch, seq = 2, 8

    key = jax.random.PRNGKey(0)
    k_obs, k_par = jax.random.split(key)
    obs = jax.random.normal(k_obs, (batch, seq, obs_dim), jnp.float32)
    params = make_params(k_par, obs_dim, act_dim, hidden_size)

    mu, cov, v = lstm_actor_critic_forward(obs, params, act_dim)
    jax.block_until_ready((mu, cov, v))

    mu_r, cov_r, v_r = _ref_forward(obs, params, act_dim)
    np.testing.assert_allclose(np.asarray(mu), np.asarray(mu_r), atol=2e-3, rtol=2e-3)
    np.testing.assert_allclose(np.asarray(cov), np.asarray(cov_r), atol=2e-3, rtol=2e-3)
    np.testing.assert_allclose(np.asarray(v), np.asarray(v_r), atol=2e-3, rtol=2e-3)

    assert mu.shape == (batch, act_dim)
    assert cov.shape == (batch, act_dim, act_dim)
    assert v.shape == (batch,)
    print("KERNEL_OK")
</pallas_src>

<mosaic_0001>
module attributes {stable_mosaic.version = 11 : i64} {
  func.func @kernel(%arg0: memref<16x16xf32, #tpu.memory_space<vmem>>, %arg1: memref<16x512xf32, #tpu.memory_space<vmem>>, %arg2: memref<128x512xf32, #tpu.memory_space<vmem>>, %arg3: memref<1x512xf32, #tpu.memory_space<vmem>>, %arg4: memref<128x128xf32, #tpu.memory_space<vmem>>, %arg5: memref<1x128xf32, #tpu.memory_space<vmem>>, %arg6: memref<2x128xf32, #tpu.memory_space<vmem>>) attributes {dimension_semantics = [], scalar_prefetch = 0 : i64, scratch_operands = 0 : i64, tpu.core_type = #tpu.core_type<tc>} {
    %c0 = arith.constant 0 : index
    %c0_0 = arith.constant 0 : index
    %0 = vector.load %arg0[%c0, %c0_0] : memref<16x16xf32, #tpu.memory_space<vmem>>, vector<16x16xf32>
    %c0_1 = arith.constant 0 : index
    %c0_2 = arith.constant 0 : index
    %1 = vector.load %arg1[%c0_1, %c0_2] : memref<16x512xf32, #tpu.memory_space<vmem>>, vector<16x512xf32>
    %cst = arith.constant dense<0.000000e+00> : vector<16x512xf32>
    %2 = tpu.matmul %0, %1, %cst {dimension_numbers = #tpu.dot_dimension_numbers<[1], [0], [0], [1], [0, 0, 1, 1], [], []>} : vector<16x16xf32>, vector<16x512xf32>, vector<16x512xf32> -> vector<16x512xf32>
    %c0_3 = arith.constant 0 : index
    %c0_4 = arith.constant 0 : index
    %3 = vector.load %arg3[%c0_3, %c0_4] : memref<1x512xf32, #tpu.memory_space<vmem>>, vector<1x512xf32>
    %4 = vector.broadcast %3 : vector<1x512xf32> to vector<16x512xf32>
    %5 = arith.addf %2, %4 : vector<16x512xf32>
    %c0_5 = arith.constant 0 : index
    %c0_6 = arith.constant 0 : index
    %6 = vector.load %arg2[%c0_5, %c0_6] : memref<128x512xf32, #tpu.memory_space<vmem>>, vector<128x512xf32>
    %cst_7 = arith.constant 0.000000e+00 : f32
    %7 = vector.broadcast %cst_7 : f32 to vector<2x128xf32>
    %cst_8 = arith.constant 0.000000e+00 : f32
    %8 = vector.broadcast %cst_8 : f32 to vector<2x128xf32>
    %9 = vector.extract_strided_slice %5 {offsets = [0, 0], sizes = [2, 512], strides = [1, 1]} : vector<16x512xf32> to vector<2x512xf32>
    %cst_9 = arith.constant dense<0.000000e+00> : vector<2x512xf32>
    %10 = tpu.matmul %7, %6, %cst_9 {dimension_numbers = #tpu.dot_dimension_numbers<[1], [0], [0], [1], [0, 0, 1, 1], [], []>} : vector<2x128xf32>, vector<128x512xf32>, vector<2x512xf32> -> vector<2x512xf32>
    %11 = arith.addf %9, %10 : vector<2x512xf32>
    %12 = vector.extract_strided_slice %11 {offsets = [0, 0], sizes = [2, 128], strides = [1, 1]} : vector<2x512xf32> to vector<2x128xf32>
    %13 = arith.negf %12 : vector<2x128xf32>
    %14 = math.exp %13 : vector<2x128xf32>
    %cst_10 = arith.constant 1.000000e+00 : f32
    %15 = vector.broadcast %cst_10 : f32 to vector<2x128xf32>
    %16 = arith.addf %15, %14 : vector<2x128xf32>
    %17 = arith.divf %15, %16 : vector<2x128xf32>
    %18 = vector.extract_strided_slice %11 {offsets = [0, 128], sizes = [2, 128], strides = [1, 1]} : vector<2x512xf32> to vector<2x128xf32>
    %19 = arith.negf %18 : vector<2x128xf32>
    %20 = math.exp %19 : vector<2x128xf32>
    %cst_11 = arith.constant 1.000000e+00 : f32
    %21 = vector.broadcast %cst_11 : f32 to vector<2x128xf32>
    %22 = arith.addf %21, %20 : vector<2x128xf32>
    %23 = arith.divf %21, %22 : vector<2x128xf32>
    %24 = vector.extract_strided_slice %11 {offsets = [0, 256], sizes = [2, 128], strides = [1, 1]} : vector<2x512xf32> to vector<2x128xf32>
    %25 = math.tanh %24 : vector<2x128xf32>
    %26 = vector.extract_strided_slice %11 {offsets = [0, 384], sizes = [2, 128], strides = [1, 1]} : vector<2x512xf32> to vector<2x128xf32>
    %27 = arith.negf %26 : vector<2x128xf32>
    %28 = math.exp %27 : vector<2x128xf32>
    %cst_12 = arith.constant 1.000000e+00 : f32
    %29 = vector.broadcast %cst_12 : f32 to vector<2x128xf32>
    %30 = arith.addf %29, %28 : vector<2x128xf32>
    %31 = arith.divf %29, %30 : vector<2x128xf32>
    %32 = arith.mulf %23, %8 : vector<2x128xf32>
    %33 = arith.mulf %17, %25 : vector<2x128xf32>
    %34 = arith.addf %32, %33 : vector<2x128xf32>
    %35 = math.tanh %34 : vector<2x128xf32>
    %36 = arith.mulf %31, %35 : vector<2x128xf32>
    %37 = vector.extract_strided_slice %5 {offsets = [2, 0], sizes = [2, 512], strides = [1, 1]} : vector<16x512xf32> to vector<2x512xf32>
    %cst_13 = arith.constant dense<0.000000e+00> : vector<2x512xf32>
    %38 = tpu.matmul %36, %6, %cst_13 {dimension_numbers = #tpu.dot_dimension_numbers<[1], [0], [0], [1], [0, 0, 1, 1], [], []>} : vector<2x128xf32>, vector<128x512xf32>, vector<2x512xf32> -> vector<2x512xf32>
    %39 = arith.addf %37, %38 : vector<2x512xf32>
    %40 = vector.extract_strided_slice %39 {offsets = [0, 0], sizes = [2, 128], strides = [1, 1]} : vector<2x512xf32> to vector<2x128xf32>
    %41 = arith.negf %40 : vector<2x128xf32>
    %42 = math.exp %41 : vector<2x128xf32>
    %cst_14 = arith.constant 1.000000e+00 : f32
    %43 = vector.broadcast %cst_14 : f32 to vector<2x128xf32>
    %44 = arith.addf %43, %42 : vector<2x128xf32>
    %45 = arith.divf %43, %44 : vector<2x128xf32>
    %46 = vector.extract_strided_slice %39 {offsets = [0, 128], sizes = [2, 128], strides = [1, 1]} : vector<2x512xf32> to vector<2x128xf32>
    %47 = arith.negf %46 : vector<2x128xf32>
    %48 = math.exp %47 : vector<2x128xf32>
    %cst_15 = arith.constant 1.000000e+00 : f32
    %49 = vector.broadcast %cst_15 : f32 to vector<2x128xf32>
    %50 = arith.addf %49, %48 : vector<2x128xf32>
    %51 = arith.divf %49, %50 : vector<2x128xf32>
    %52 = vector.extract_strided_slice %39 {offsets = [0, 256], sizes = [2, 128], strides = [1, 1]} : vector<2x512xf32> to vector<2x128xf32>
    %53 = math.tanh %52 : vector<2x128xf32>
    %54 = vector.extract_strided_slice %39 {offsets = [0, 384], sizes = [2, 128], strides = [1, 1]} : vector<2x512xf32> to vector<2x128xf32>
    %55 = arith.negf %54 : vector<2x128xf32>
    %56 = math.exp %55 : vector<2x128xf32>
    %cst_16 = arith.constant 1.000000e+00 : f32
    %57 = vector.broadcast %cst_16 : f32 to vector<2x128xf32>
    %58 = arith.addf %57, %56 : vector<2x128xf32>
    %59 = arith.divf %57, %58 : vector<2x128xf32>
    %60 = arith.mulf %51, %34 : vector<2x128xf32>
    %61 = arith.mulf %45, %53 : vector<2x128xf32>
    %62 = arith.addf %60, %61 : vector<2x128xf32>
    %63 = math.tanh %62 : vector<2x128xf32>
    %64 = arith.mulf %59, %63 : vector<2x128xf32>
    %65 = vector.extract_strided_slice %5 {offsets = [4, 0], sizes = [2, 512], strides = [1, 1]} : vector<16x512xf32> to vector<2x512xf32>
    %cst_17 = arith.constant dense<0.000000e+00> : vector<2x512xf32>
    %66 = tpu.matmul %64, %6, %cst_17 {dimension_numbers = #tpu.dot_dimension_numbers<[1], [0], [0], [1], [0, 0, 1, 1], [], []>} : vector<2x128xf32>, vector<128x512xf32>, vector<2x512xf32> -> vector<2x512xf32>
    %67 = arith.addf %65, %66 : vector<2x512xf32>
    %68 = vector.extract_strided_slice %67 {offsets = [0, 0], sizes = [2, 128], strides = [1, 1]} : vector<2x512xf32> to vector<2x128xf32>
    %69 = arith.negf %68 : vector<2x128xf32>
    %70 = math.exp %69 : vector<2x128xf32>
    %cst_18 = arith.constant 1.000000e+00 : f32
    %71 = vector.broadcast %cst_18 : f32 to vector<2x128xf32>
    %72 = arith.addf %71, %70 : vector<2x128xf32>
    %73 = arith.divf %71, %72 : vector<2x128xf32>
    %74 = vector.extract_strided_slice %67 {offsets = [0, 128], sizes = [2, 128], strides = [1, 1]} : vector<2x512xf32> to vector<2x128xf32>
    %75 = arith.negf %74 : vector<2x128xf32>
    %76 = math.exp %75 : vector<2x128xf32>
    %cst_19 = arith.constant 1.000000e+00 : f32
    %77 = vector.broadcast %cst_19 : f32 to vector<2x128xf32>
    %78 = arith.addf %77, %76 : vector<2x128xf32>
    %79 = arith.divf %77, %78 : vector<2x128xf32>
    %80 = vector.extract_strided_slice %67 {offsets = [0, 256], sizes = [2, 128], strides = [1, 1]} : vector<2x512xf32> to vector<2x128xf32>
    %81 = math.tanh %80 : vector<2x128xf32>
    %82 = vector.extract_strided_slice %67 {offsets = [0, 384], sizes = [2, 128], strides = [1, 1]} : vector<2x512xf32> to vector<2x128xf32>
    %83 = arith.negf %82 : vector<2x128xf32>
    %84 = math.exp %83 : vector<2x128xf32>
    %cst_20 = arith.constant 1.000000e+00 : f32
    %85 = vector.broadcast %cst_20 : f32 to vector<2x128xf32>
    %86 = arith.addf %85, %84 : vector<2x128xf32>
    %87 = arith.divf %85, %86 : vector<2x128xf32>
    %88 = arith.mulf %79, %62 : vector<2x128xf32>
    %89 = arith.mulf %73, %81 : vector<2x128xf32>
    %90 = arith.addf %88, %89 : vector<2x128xf32>
    %91 = math.tanh %90 : vector<2x128xf32>
    %92 = arith.mulf %87, %91 : vector<2x128xf32>
    %93 = vector.extract_strided_slice %5 {offsets = [6, 0], sizes = [2, 512], strides = [1, 1]} : vector<16x512xf32> to vector<2x512xf32>
    %cst_21 = arith.constant dense<0.000000e+00> : vector<2x512xf32>
    %94 = tpu.matmul %92, %6, %cst_21 {dimension_numbers = #tpu.dot_dimension_numbers<[1], [0], [0], [1], [0, 0, 1, 1], [], []>} : vector<2x128xf32>, vector<128x512xf32>, vector<2x512xf32> -> vector<2x512xf32>
    %95 = arith.addf %93, %94 : vector<2x512xf32>
    %96 = vector.extract_strided_slice %95 {offsets = [0, 0], sizes = [2, 128], strides = [1, 1]} : vector<2x512xf32> to vector<2x128xf32>
    %97 = arith.negf %96 : vector<2x128xf32>
    %98 = math.exp %97 : vector<2x128xf32>
    %cst_22 = arith.constant 1.000000e+00 : f32
    %99 = vector.broadcast %cst_22 : f32 to vector<2x128xf32>
    %100 = arith.addf %99, %98 : vector<2x128xf32>
    %101 = arith.divf %99, %100 : vector<2x128xf32>
    %102 = vector.extract_strided_slice %95 {offsets = [0, 128], sizes = [2, 128], strides = [1, 1]} : vector<2x512xf32> to vector<2x128xf32>
    %103 = arith.negf %102 : vector<2x128xf32>
    %104 = math.exp %103 : vector<2x128xf32>
    %cst_23 = arith.constant 1.000000e+00 : f32
    %105 = vector.broadcast %cst_23 : f32 to vector<2x128xf32>
    %106 = arith.addf %105, %104 : vector<2x128xf32>
    %107 = arith.divf %105, %106 : vector<2x128xf32>
    %108 = vector.extract_strided_slice %95 {offsets = [0, 256], sizes = [2, 128], strides = [1, 1]} : vector<2x512xf32> to vector<2x128xf32>
    %109 = math.tanh %108 : vector<2x128xf32>
    %110 = vector.extract_strided_slice %95 {offsets = [0, 384], sizes = [2, 128], strides = [1, 1]} : vector<2x512xf32> to vector<2x128xf32>
    %111 = arith.negf %110 : vector<2x128xf32>
    %112 = math.exp %111 : vector<2x128xf32>
    %cst_24 = arith.constant 1.000000e+00 : f32
    %113 = vector.broadcast %cst_24 : f32 to vector<2x128xf32>
    %114 = arith.addf %113, %112 : vector<2x128xf32>
    %115 = arith.divf %113, %114 : vector<2x128xf32>
    %116 = arith.mulf %107, %90 : vector<2x128xf32>
    %117 = arith.mulf %101, %109 : vector<2x128xf32>
    %118 = arith.addf %116, %117 : vector<2x128xf32>
    %119 = math.tanh %118 : vector<2x128xf32>
    %120 = arith.mulf %115, %119 : vector<2x128xf32>
    %121 = vector.extract_strided_slice %5 {offsets = [8, 0], sizes = [2, 512], strides = [1, 1]} : vector<16x512xf32> to vector<2x512xf32>
    %cst_25 = arith.constant dense<0.000000e+00> : vector<2x512xf32>
    %122 = tpu.matmul %120, %6, %cst_25 {dimension_numbers = #tpu.dot_dimension_numbers<[1], [0], [0], [1], [0, 0, 1, 1], [], []>} : vector<2x128xf32>, vector<128x512xf32>, vector<2x512xf32> -> vector<2x512xf32>
    %123 = arith.addf %121, %122 : vector<2x512xf32>
    %124 = vector.extract_strided_slice %123 {offsets = [0, 0], sizes = [2, 128], strides = [1, 1]} : vector<2x512xf32> to vector<2x128xf32>
    %125 = arith.negf %124 : vector<2x128xf32>
    %126 = math.exp %125 : vector<2x128xf32>
    %cst_26 = arith.constant 1.000000e+00 : f32
    %127 = vector.broadcast %cst_26 : f32 to vector<2x128xf32>
    %128 = arith.addf %127, %126 : vector<2x128xf32>
    %129 = arith.divf %127, %128 : vector<2x128xf32>
    %130 = vector.extract_strided_slice %123 {offsets = [0, 128], sizes = [2, 128], strides = [1, 1]} : vector<2x512xf32> to vector<2x128xf32>
    %131 = arith.negf %130 : vector<2x128xf32>
    %132 = math.exp %131 : vector<2x128xf32>
    %cst_27 = arith.constant 1.000000e+00 : f32
    %133 = vector.broadcast %cst_27 : f32 to vector<2x128xf32>
    %134 = arith.addf %133, %132 : vector<2x128xf32>
    %135 = arith.divf %133, %134 : vector<2x128xf32>
    %136 = vector.extract_strided_slice %123 {offsets = [0, 256], sizes = [2, 128], strides = [1, 1]} : vector<2x512xf32> to vector<2x128xf32>
    %137 = math.tanh %136 : vector<2x128xf32>
    %138 = vector.extract_strided_slice %123 {offsets = [0, 384], sizes = [2, 128], strides = [1, 1]} : vector<2x512xf32> to vector<2x128xf32>
    %139 = arith.negf %138 : vector<2x128xf32>
    %140 = math.exp %139 : vector<2x128xf32>
    %cst_28 = arith.constant 1.000000e+00 : f32
    %141 = vector.broadcast %cst_28 : f32 to vector<2x128xf32>
    %142 = arith.addf %141, %140 : vector<2x128xf32>
    %143 = arith.divf %141, %142 : vector<2x128xf32>
    %144 = arith.mulf %135, %118 : vector<2x128xf32>
    %145 = arith.mulf %129, %137 : vector<2x128xf32>
    %146 = arith.addf %144, %145 : vector<2x128xf32>
    %147 = math.tanh %146 : vector<2x128xf32>
    %148 = arith.mulf %143, %147 : vector<2x128xf32>
    %149 = vector.extract_strided_slice %5 {offsets = [10, 0], sizes = [2, 512], strides = [1, 1]} : vector<16x512xf32> to vector<2x512xf32>
    %cst_29 = arith.constant dense<0.000000e+00> : vector<2x512xf32>
    %150 = tpu.matmul %148, %6, %cst_29 {dimension_numbers = #tpu.dot_dimension_numbers<[1], [0], [0], [1], [0, 0, 1, 1], [], []>} : vector<2x128xf32>, vector<128x512xf32>, vector<2x512xf32> -> vector<2x512xf32>
    %151 = arith.addf %149, %150 : vector<2x512xf32>
    %152 = vector.extract_strided_slice %151 {offsets = [0, 0], sizes = [2, 128], strides = [1, 1]} : vector<2x512xf32> to vector<2x128xf32>
    %153 = arith.negf %152 : vector<2x128xf32>
    %154 = math.exp %153 : vector<2x128xf32>
    %cst_30 = arith.constant 1.000000e+00 : f32
    %155 = vector.broadcast %cst_30 : f32 to vector<2x128xf32>
    %156 = arith.addf %155, %154 : vector<2x128xf32>
    %157 = arith.divf %155, %156 : vector<2x128xf32>
    %158 = vector.extract_strided_slice %151 {offsets = [0, 128], sizes = [2, 128], strides = [1, 1]} : vector<2x512xf32> to vector<2x128xf32>
    %159 = arith.negf %158 : vector<2x128xf32>
    %160 = math.exp %159 : vector<2x128xf32>
    %cst_31 = arith.constant 1.000000e+00 : f32
    %161 = vector.broadcast %cst_31 : f32 to vector<2x128xf32>
    %162 = arith.addf %161, %160 : vector<2x128xf32>
    %163 = arith.divf %161, %162 : vector<2x128xf32>
    %164 = vector.extract_strided_slice %151 {offsets = [0, 256], sizes = [2, 128], strides = [1, 1]} : vector<2x512xf32> to vector<2x128xf32>
    %165 = math.tanh %164 : vector<2x128xf32>
    %166 = vector.extract_strided_slice %151 {offsets = [0, 384], sizes = [2, 128], strides = [1, 1]} : vector<2x512xf32> to vector<2x128xf32>
    %167 = arith.negf %166 : vector<2x128xf32>
    %168 = math.exp %167 : vector<2x128xf32>
    %cst_32 = arith.constant 1.000000e+00 : f32
    %169 = vector.broadcast %cst_32 : f32 to vector<2x128xf32>
    %170 = arith.addf %169, %168 : vector<2x128xf32>
    %171 = arith.divf %169, %170 : vector<2x128xf32>
    %172 = arith.mulf %163, %146 : vector<2x128xf32>
    %173 = arith.mulf %157, %165 : vector<2x128xf32>
    %174 = arith.addf %172, %173 : vector<2x128xf32>
    %175 = math.tanh %174 : vector<2x128xf32>
    %176 = arith.mulf %171, %175 : vector<2x128xf32>
    %177 = vector.extract_strided_slice %5 {offsets = [12, 0], sizes = [2, 512], strides = [1, 1]} : vector<16x512xf32> to vector<2x512xf32>
    %cst_33 = arith.constant dense<0.000000e+00> : vector<2x512xf32>
    %178 = tpu.matmul %176, %6, %cst_33 {dimension_numbers = #tpu.dot_dimension_numbers<[1], [0], [0], [1], [0, 0, 1, 1], [], []>} : vector<2x128xf32>, vector<128x512xf32>, vector<2x512xf32> -> vector<2x512xf32>
    %179 = arith.addf %177, %178 : vector<2x512xf32>
    %180 = vector.extract_strided_slice %179 {offsets = [0, 0], sizes = [2, 128], strides = [1, 1]} : vector<2x512xf32> to vector<2x128xf32>
    %181 = arith.negf %180 : vector<2x128xf32>
    %182 = math.exp %181 : vector<2x128xf32>
    %cst_34 = arith.constant 1.000000e+00 : f32
    %183 = vector.broadcast %cst_34 : f32 to vector<2x128xf32>
    %184 = arith.addf %183, %182 : vector<2x128xf32>
    %185 = arith.divf %183, %184 : vector<2x128xf32>
    %186 = vector.extract_strided_slice %179 {offsets = [0, 128], sizes = [2, 128], strides = [1, 1]} : vector<2x512xf32> to vector<2x128xf32>
    %187 = arith.negf %186 : vector<2x128xf32>
    %188 = math.exp %187 : vector<2x128xf32>
    %cst_35 = arith.constant 1.000000e+00 : f32
    %189 = vector.broadcast %cst_35 : f32 to vector<2x128xf32>
    %190 = arith.addf %189, %188 : vector<2x128xf32>
    %191 = arith.divf %189, %190 : vector<2x128xf32>
    %192 = vector.extract_strided_slice %179 {offsets = [0, 256], sizes = [2, 128], strides = [1, 1]} : vector<2x512xf32> to vector<2x128xf32>
    %193 = math.tanh %192 : vector<2x128xf32>
    %194 = vector.extract_strided_slice %179 {offsets = [0, 384], sizes = [2, 128], strides = [1, 1]} : vector<2x512xf32> to vector<2x128xf32>
    %195 = arith.negf %194 : vector<2x128xf32>
    %196 = math.exp %195 : vector<2x128xf32>
    %cst_36 = arith.constant 1.000000e+00 : f32
    %197 = vector.broadcast %cst_36 : f32 to vector<2x128xf32>
    %198 = arith.addf %197, %196 : vector<2x128xf32>
    %199 = arith.divf %197, %198 : vector<2x128xf32>
    %200 = arith.mulf %191, %174 : vector<2x128xf32>
    %201 = arith.mulf %185, %193 : vector<2x128xf32>
    %202 = arith.addf %200, %201 : vector<2x128xf32>
    %203 = math.tanh %202 : vector<2x128xf32>
    %204 = arith.mulf %199, %203 : vector<2x128xf32>
    %205 = vector.extract_strided_slice %5 {offsets = [14, 0], sizes = [2, 512], strides = [1, 1]} : vector<16x512xf32> to vector<2x512xf32>
    %cst_37 = arith.constant dense<0.000000e+00> : vector<2x512xf32>
    %206 = tpu.matmul %204, %6, %cst_37 {dimension_numbers = #tpu.dot_dimension_numbers<[1], [0], [0], [1], [0, 0, 1, 1], [], []>} : vector<2x128xf32>, vector<128x512xf32>, vector<2x512xf32> -> vector<2x512xf32>
    %207 = arith.addf %205, %206 : vector<2x512xf32>
    %208 = vector.extract_strided_slice %207 {offsets = [0, 0], sizes = [2, 128], strides = [1, 1]} : vector<2x512xf32> to vector<2x128xf32>
    %209 = arith.negf %208 : vector<2x128xf32>
    %210 = math.exp %209 : vector<2x128xf32>
    %cst_38 = arith.constant 1.000000e+00 : f32
    %211 = vector.broadcast %cst_38 : f32 to vector<2x128xf32>
    %212 = arith.addf %211, %210 : vector<2x128xf32>
    %213 = arith.divf %211, %212 : vector<2x128xf32>
    %214 = vector.extract_strided_slice %207 {offsets = [0, 128], sizes = [2, 128], strides = [1, 1]} : vector<2x512xf32> to vector<2x128xf32>
    %215 = arith.negf %214 : vector<2x128xf32>
    %216 = math.exp %215 : vector<2x128xf32>
    %cst_39 = arith.constant 1.000000e+00 : f32
    %217 = vector.broadcast %cst_39 : f32 to vector<2x128xf32>
    %218 = arith.addf %217, %216 : vector<2x128xf32>
    %219 = arith.divf %217, %218 : vector<2x128xf32>
    %220 = vector.extract_strided_slice %207 {offsets = [0, 256], sizes = [2, 128], strides = [1, 1]} : vector<2x512xf32> to vector<2x128xf32>
    %221 = math.tanh %220 : vector<2x128xf32>
    %222 = vector.extract_strided_slice %207 {offsets = [0, 384], sizes = [2, 128], strides = [1, 1]} : vector<2x512xf32> to vector<2x128xf32>
    %223 = arith.negf %222 : vector<2x128xf32>
    %224 = math.exp %223 : vector<2x128xf32>
    %cst_40 = arith.constant 1.000000e+00 : f32
    %225 = vector.broadcast %cst_40 : f32 to vector<2x128xf32>
    %226 = arith.addf %225, %224 : vector<2x128xf32>
    %227 = arith.divf %225, %226 : vector<2x128xf32>
    %228 = arith.mulf %219, %202 : vector<2x128xf32>
    %229 = arith.mulf %213, %221 : vector<2x128xf32>
    %230 = arith.addf %228, %229 : vector<2x128xf32>
    %231 = math.tanh %230 : vector<2x128xf32>
    %232 = arith.mulf %227, %231 : vector<2x128xf32>
    %c0_41 = arith.constant 0 : index
    %c0_42 = arith.constant 0 : index
    %233 = vector.load %arg4[%c0_41, %c0_42] : memref<128x128xf32, #tpu.memory_space<vmem>>, vector<128x128xf32>
    %cst_43 = arith.constant dense<0.000000e+00> : vector<2x128xf32>
    %234 = tpu.matmul %232, %233, %cst_43 {dimension_numbers = #tpu.dot_dimension_numbers<[1], [0], [0], [1], [0, 0, 1, 1], [], []>} : vector<2x128xf32>, vector<128x128xf32>, vector<2x128xf32> -> vector<2x128xf32>
    %c0_44 = arith.constant 0 : index
    %c0_45 = arith.constant 0 : index
    %235 = vector.load %arg5[%c0_44, %c0_45] : memref<1x128xf32, #tpu.memory_space<vmem>>, vector<1x128xf32>
    %236 = vector.broadcast %235 : vector<1x128xf32> to vector<2x128xf32>
    %237 = arith.addf %234, %236 : vector<2x128xf32>
    %c0_46 = arith.constant 0 : index
    %c0_47 = arith.constant 0 : index
    %238 = vector.load %arg6[%c0_46, %c0_47] : memref<2x128xf32, #tpu.memory_space<vmem>>, vector<2x128xf32>
    tpu.vector_store %arg6[%c0_46, %c0_47], %237 {strides = array<i32>} : memref<2x128xf32, #tpu.memory_space<vmem>>, vector<2x128xf32>,
    return
  }
}

</mosaic_0001>

<bundles_post_ra>
// kernel: tpu_custom_call.1
= control target key start
LH: loop header
LB: loop body
LE: loop exit
PB: predicated region body
PF: predicated region fallthrough
CT: control target
= control target key end

     0   :  { %11 = vsyncpa [#allocation3], 0  ;;  %s3274_s0 = inlined_call_operand.hbm [shape: f32[16,16], index: 0, kind: input, shape index: {}]   ;;  %s3275_s1 = inlined_call_operand.hbm [shape: f32[16,512], index: 1, kind: input, shape index: {}]   ;;  %s3276_s2 = inlined_call_operand.hbm [shape: f32[128,512], index: 2, kind: input, shape index: {}]   ;;  %s3277_s3 = inlined_call_operand.vmem [shape: f32[1,512], index: 3, kind: input, shape index: {}]   ;;  %s3278_s4 = inlined_call_operand.hbm [shape: f32[128,128], index: 4, kind: input, shape index: {}]   ;;  %s3279_s5 = inlined_call_operand.vmem [shape: f32[1,128], index: 5, kind: input, shape index: {}]   ;;  %s3280_s6 = inlined_call_operand.hbm [shape: f32[2,128], index: 6, kind: output, shape index: {}]  }
   0x1   :  { %12 = vsyncpa [#allocation6], 0 }
   0x2   :  { %13 = vsyncpa [#allocation9], 0 }
   0x3   :  { %14 = vsyncpa [#allocation4], 0  ;;  %s2310_s21 = smov [#allocation5]  }
   0x4   :  { %s32_s22 = sshll.u32 %s2310_s21, 4  ;;  %s33_s22 = int_to_ptr.vmem [resolvable:$true] %s32_s22 }
   0x5   :  { %s2210_s23 = scalar_lea.vmem %s33_s22, 1024  ;;  %p2215_p1 = scmp.lt.s32.totalorder %s33_s22, %s33_s22 }
   0x6   :  { %p2211_p0 = scmp.ne.s32.totalorder %s33_s22, %s2210_s23  ;;  %p2216_p2 = scmp.lt.s32.totalorder %s2210_s23, %s2210_s23 }
   0x8   :  { %p2217_p3 = por %p2216_p2, %p2215_p1 }
   0xa   :  { %p2218_p4 = pnand %p2217_p3, %p2211_p0 }
   0xc   :  { %2221 = shalt.err (!%p2218_p4)
}
   0xd   :  { %s2311_s24 = smov 512   ;;  %s2312_s25 = smov 32  }
   0xe   :  { %38 = dma.hbm_to_vmem [thread:$0]  %s3275_s1, 1024, %s33_s22, [#allocation6], %s2311_s24, %s2311_s24, %s2312_s25  }
   0xf   :  { %s2313_s28 = smov [#allocation2]  }
  0x10   :  { %s20_s29 = sshll.u32 %s2313_s28, 4  ;;  %s21_s29 = int_to_ptr.vmem [resolvable:$true] %s20_s29 }
  0x11   :  { %s2230_s30 = scalar_lea.vmem %s21_s29, 256  ;;  %p2235_p6 = scmp.lt.s32.totalorder %s21_s29, %s21_s29 }
  0x12   :  { %p2231_p5 = scmp.ne.s32.totalorder %s21_s29, %s2230_s30  ;;  %p2236_p7 = scmp.lt.s32.totalorder %s2230_s30, %s2230_s30 }
  0x14   :  { %p2237_p8 = por %p2236_p7, %p2235_p6 }
  0x16   :  { %p2238_p9 = pnand %p2237_p8, %p2231_p5 }
  0x18   :  { %2241 = shalt.err (!%p2238_p9)
}
  0x19   :  { %s2314_s7 = smov 128   ;;  %s2315_s8 = smov 8  }
  0x1a   :  { %26 = dma.hbm_to_vmem [thread:$0]  %s3274_s0, 256, %s21_s29, [#allocation3], %s2314_s7, %s2314_s7, %s2315_s8  }
  0x1b   :  { %s2316_s11 = smov [#allocation7]   ;;  %s2317_s13 = smov [#allocation8]  }
  0x1c   :  { %s44_s12 = sshll.u32 %s2316_s11, 4  ;;  %s58_s1 = sshll.u32 %s2317_s13, 4  ;;  %s45_s12 = int_to_ptr.vmem [resolvable:$true] %s44_s12  ;;  %s59_s1 = int_to_ptr.vmem [resolvable:$true] %s58_s1 }
  0x1d   :  { %s2250_s14 = scalar_lea.vmem %s45_s12, 8192  ;;  %p2255_p11 = scmp.lt.s32.totalorder %s45_s12, %s45_s12 }
  0x1e   :  { %p2251_p10 = scmp.ne.s32.totalorder %s45_s12, %s2250_s14  ;;  %p2256_p12 = scmp.lt.s32.totalorder %s2250_s14, %s2250_s14 }
  0x20   :  { %p2257_p13 = por %p2256_p12, %p2255_p11 }
  0x22   :  { %p2258_p0 = pnand %p2257_p13, %p2251_p10 }
  0x24   :  { %2261 = shalt.err (!%p2258_p0)
}
  0x25   :  { %50 = dma.hbm_to_vmem [thread:$0]  %s3276_s2, 8192, %s45_s12, [#allocation6], %s2311_s24, %s2311_s24, %s2312_s25  }
  0x26   :  { %s2270_s0 = scalar_lea.vmem %s59_s1, 2048  ;;  %p2275_p2 = scmp.lt.s32.totalorder %s59_s1, %s59_s1 }
  0x27   :  { %p2271_p1 = scmp.ne.s32.totalorder %s59_s1, %s2270_s0  ;;  %p2276_p3 = scmp.lt.s32.totalorder %s2270_s0, %s2270_s0 }
  0x29   :  { %p2277_p4 = por %p2276_p3, %p2275_p2 }
  0x2b   :  { %p2278_p5 = pnand %p2277_p4, %p2271_p1 }
  0x2d   :  { %2281 = shalt.err (!%p2278_p5)
}
  0x2e   :  { %64 = dma.hbm_to_vmem [thread:$0]  %s3278_s4, 2048, %s59_s1, [#allocation9], %s2314_s7, %s2314_s7, %s2315_s8  }
  0x2f   :  { %2302 = dma.done.wait [#allocation3], 256  }
  0x30   :  { %2303 = vsyncadd [#allocation3], 4294967040 }
  0x31   :  { %2304 = dma.done.wait [#allocation6], 9216  }
  0x32   :  { %2305 = vsyncadd [#allocation6], 4294958080 }
  0x33   :  { %2306 = dma.done.wait [#allocation9], 2048  }
  0x34   :  { %2307 = vsyncadd [#allocation9], 4294965248  ;;  %v3293_v0 = vmov 0.0   ;;  %v86_v1 = vld [vmem:[#allocation5 + $0x28] sm:$0xff]  ;;  %v85_v3 = vld [vmem:[#allocation5 + $0x20] sm:$0xff]  ;;  %vm111_vm0 = vcmask 130048  }
  0x35   :  { %182 = vmatprep.mubr.f32.mxu1 %v3293_v0  ;;  %400 = vmatprep.mubr.f32.mxu0 %v3293_v0  ;;  %v2376_v2 = vld [vmem:[#allocation7 + $0x1e8] sm:$0xff]  ;;  %v2379_v4 = vld [vmem:[#allocation7 + $0x1e0] sm:$0xff]  ;;  %v79_v9 = vld [vmem:[#allocation2] sm:$0xff]  ;;  %vm2319_vm1 = vmmov 0   ;;  %s2320_s20 = smov [#allocation10]  }
  0x36   :  { %3374 = vst [vmem:[#allocation15_spill] sm:$0xff] %v2376_v2  ;;  %146 = vmatprep.subr.mxu1 %v86_v1  ;;  %336 = vmatprep.subr.mxu0 %v2376_v2  ;;  %v82_v5 = vld [vmem:[#allocation5 + $0x8] sm:$0xff]  ;;  %v81_v7 = vld [vmem:[#allocation5] sm:$0xff]  ;;  %v88_v13 = vld [vmem:[#allocation5 + $0x38] sm:$0xff]  ;;  %s1907_s21 = sshll.u32 %s2320_s20, 4  ;;  %s1908_s21 = int_to_ptr.vmem [resolvable:$true] %s1907_s21 }
  0x37   :  { %v2381_v6 = vld [vmem:[#allocation7 + $0x1c8] sm:$0xff]  ;;  %147 = vmatpush1.msra.mxu1 %v85_v3  ;;  %337 = vmatpush1.msra.mxu0 %v2379_v4  ;;  %v2384_v8 = vld [vmem:[#allocation7 + $0x1c0] sm:$0xff]  ;;  %v87_v15 = vld [vmem:[#allocation5 + $0x30] sm:$0xff]  ;;  %s2282_s22 = scalar_lea.vmem %s1908_s21, 32  ;;  %p2287_p7 = scmp.lt.s32.totalorder %s1908_s21, %s1908_s21 }
  0x38   :  { %148 = vmatprep.subr.mxu1 %v82_v5  ;;  %338 = vmatprep.subr.mxu0 %v2381_v6  ;;  %v2387_v10 = vld [vmem:[#allocation7 + $0x1a8] sm:$0xff]  ;;  %v2389_v11 = vld [vmem:[#allocation7 + $0x1a0] sm:$0xff]  ;;  %v2400_v16 = vld [vmem:[#allocation2 + $0x8] sm:$0xff]  ;;  %p2283_p6 = scmp.ne.s32.totalorder %s1908_s21, %s2282_s22  ;;  %p2288_p8 = scmp.lt.s32.totalorder %s2282_s22, %s2282_s22 }
  0x39   :  { %149 = vmatpush1.msra.mxu1 %v81_v7  ;;  %339 = vmatpush1.msra.mxu0 %v2384_v8  ;;  %v2392_v12 = vld [vmem:[#allocation7 + $0x188] sm:$0xff]  ;;  %v2396_v14 = vld [vmem:[#allocation7 + $0x180] sm:$0xff]  ;;  %v84_v18 = vld [vmem:[#allocation5 + $0x18] sm:$0xff] }
  0x3a   :  { %1918 = vmatmul.mubr.msk.f32.vlgmr.msra.gmra.mxu1 %vm111_vm0, %v79_v9  ;;  %340 = vmatprep.subr.mxu0 %v2387_v10  ;;  %v2402_v17 = vld [vmem:[#allocation7 + $0x168] sm:$0xff]  ;;  %v2405_v19 = vld [vmem:[#allocation7 + $0x160] sm:$0xff]  ;;  %v83_v20 = vld [vmem:[#allocation5 + $0x10] sm:$0xff]  ;;  %p2289_p9 = por %p2288_p8, %p2287_p7 }
  0x3b   :  { %341 = vmatpush1.msra.mxu0 %v2389_v11  ;;  %188 = vmatprep.mubr.f32.mxu1 %v3293_v0  ;;  %v2408_v21 = vld [vmem:[#allocation7 + $0x148] sm:$0xff]  ;;  %v2413_v22 = vld [vmem:[#allocation7 + $0x140] sm:$0xff]  ;;  %v2416_v23 = vld [vmem:[#allocation7 + $0x1f8] sm:$0xff] }
  0x3c   :  { %342 = vmatprep.subr.mxu0 %v2392_v12  ;;  %223 = vmatprep.subr.mxu1 %v88_v13  ;;  %3375 = vst [vmem:[#allocation16_spill] sm:$0xff] %v2416_v23  ;;  %v2419_v24 = vld [vmem:[#allocation7 + $0x128] sm:$0xff]  ;;  %v2421_v25 = vld [vmem:[#allocation7 + $0x1f0] sm:$0xff]  ;;  %v2425_v26 = vld [vmem:[#allocation7 + $0x120] sm:$0xff]  ;;  %p2290_p10 = pnand %p2289_p9, %p2283_p6 }
  0x3d   :  { %343 = vmatpush1.msra.mxu0 %v2396_v14  ;;  %224 = vmatpush1.msra.mxu1 %v87_v15  ;;  %v2427_v27 = vld [vmem:[#allocation7 + $0x1d8] sm:$0xff]  ;;  %v2431_v28 = vld [vmem:[#allocation7 + $0x108] sm:$0xff]  ;;  %v2433_v29 = vld [vmem:[#allocation7 + $0x1d0] sm:$0xff] }
  0x3e   :  { %1919 = vmatmul.mubr.msk.f32.gmra.mxu1 %vm111_vm0, %v2400_v16  ;;  %344 = vmatprep.subr.mxu0 %v2402_v17  ;;  %v2437_v30 = vld [vmem:[#allocation7 + $0x100] sm:$0xff]  ;;  %v2439_v31 = vld [vmem:[#allocation7 + $0x1b8] sm:$0xff]  ;;  %v2443_v32 = vld [vmem:[#allocation7 + $0xe8] sm:$0xff] }
  0x3f   :  { %225 = vmatprep.subr.mxu1 %v84_v18  ;;  %345 = vmatpush1.msra.mxu0 %v2405_v19  ;;  %v2445_v33 = vld [vmem:[#allocation7 + $0x1b0] sm:$0xff]  ;;  %v2449_v34 = vld [vmem:[#allocation7 + $0xe0] sm:$0xff]  ;;  %v2451_v35 = vld [vmem:[#allocation7 + $0x198] sm:$0xff] }
  0x40   :  { %226 = vmatpush1.msra.mxu1 %v83_v20  ;;  %346 = vmatprep.subr.mxu0 %v2408_v21  ;;  %v2455_v36 = vld [vmem:[#allocation7 + $0xc8] sm:$0xff]  ;;  %v2457_v37 = vld [vmem:[#allocation7 + $0x190] sm:$0xff]  ;;  %v2461_v38 = vld [vmem:[#allocation7 + $0xc0] sm:$0xff] }
  0x41   :  { %259 = vmatprep.mubr.f32.mxu1 %v3293_v0  ;;  %347 = vmatpush1.msra.mxu0 %v2413_v22  ;;  %v2463_v39 = vld [vmem:[#allocation7 + $0x178] sm:$0xff]  ;;  %v2467_v40 = vld [vmem:[#allocation7 + $0xa8] sm:$0xff]  ;;  %v2469_v41 = vld [vmem:[#allocation7 + $0x170] sm:$0xff] }
  0x42   :  { %407 = vmatprep.subr.mxu1 %v2416_v23  ;;  %1920 = vmatmul.mubr.msk.f32.vlgmr.msra.gmra.mxu1 %vm111_vm0, %v79_v9  ;;  %v2473_v42 = vld [vmem:[#allocation7 + $0xa0] sm:$0xff]  ;;  %v2475_v43 = vld [vmem:[#allocation7 + $0x158] sm:$0xff]  ;;  %v2479_v44 = vld [vmem:[#allocation7 + $0x88] sm:$0xff] }
  0x43   :  { %348 = vmatprep.subr.mxu0 %v2419_v24  ;;  %408 = vmatpush1.msra.mxu1 %v2421_v25  ;;  %3376 = vst [vmem:[#allocation17_spill] sm:$0xff] %v2479_v44  ;;  %v2481_v45 = vld [vmem:[#allocation7 + $0x150] sm:$0xff]  ;;  %v2485_v46 = vld [vmem:[#allocation7 + $0x80] sm:$0xff]  ;;  %v2487_v47 = vld [vmem:[#allocation7 + $0x138] sm:$0xff] }
  0x44   :  { %349 = vmatpush1.msra.mxu0 %v2425_v26  ;;  %409 = vmatprep.subr.mxu1 %v2427_v27  ;;  %3377 = vst [vmem:[#allocation18_spill] sm:$0xff] %v2485_v46  ;;  %v2491_v48 = vld [vmem:[#allocation7 + $0x68] sm:$0xff]  ;;  %v2493_v49 = vld [vmem:[#allocation7 + $0x130] sm:$0xff]  ;;  %v2497_v50 = vld [vmem:[#allocation7 + $0x60] sm:$0xff] }
  0x45   :  { %350 = vmatprep.subr.mxu0 %v2431_v28  ;;  %410 = vmatpush1.msra.mxu1 %v2433_v29  ;;  %3378 = vst [vmem:[#allocation19_spill] sm:$0xff] %v2491_v48  ;;  %3379 = vst [vmem:[#allocation20_spill] sm:$0xff] %v2497_v50  ;;  %v2499_v51 = vld [vmem:[#allocation7 + $0x118] sm:$0xff]  ;;  %v2503_v52 = vld [vmem:[#allocation7 + $0x48] sm:$0xff] }
  0x46   :  { %351 = vmatpush1.msra.mxu0 %v2437_v30  ;;  %411 = vmatprep.subr.mxu1 %v2439_v31  ;;  %3380 = vst [vmem:[#allocation21_spill] sm:$0xff] %v2503_v52  ;;  %v2505_v53 = vld [vmem:[#allocation7 + $0x110] sm:$0xff]  ;;  %v2509_v54 = vld [vmem:[#allocation7 + $0x40] sm:$0xff]  ;;  %v2511_v55 = vld [vmem:[#allocation7 + $0xf8] sm:$0xff] }
  0x47   :  { %352 = vmatprep.subr.mxu0 %v2443_v32  ;;  %412 = vmatpush1.msra.mxu1 %v2445_v33  ;;  %3381 = vst [vmem:[#allocation22_spill] sm:$0xff] %v2509_v54  ;;  %v2515_v56 = vld [vmem:[#allocation7 + $0x28] sm:$0xff]  ;;  %v2517_v57 = vld [vmem:[#allocation7 + $0xf0] sm:$0xff]  ;;  %v2521_v58 = vld [vmem:[#allocation7 + $0x20] sm:$0xff] }
  0x48   :  { %353 = vmatpush1.msra.mxu0 %v2449_v34  ;;  %413 = vmatprep.subr.mxu1 %v2451_v35  ;;  %3382 = vst [vmem:[#allocation23_spill] sm:$0xff] %v2515_v56  ;;  %3383 = vst [vmem:[#allocation24_spill] sm:$0xff] %v2521_v58  ;;  %v2523_v59 = vld [vmem:[#allocation7 + $0xd8] sm:$0xff]  ;;  %v2527_v60 = vld [vmem:[#allocation7 + $0x8] sm:$0xff] }
  0x49   :  { %354 = vmatprep.subr.mxu0 %v2455_v36  ;;  %414 = vmatpush1.msra.mxu1 %v2457_v37  ;;  %3384 = vst [vmem:[#allocation25_spill] sm:$0xff] %v2527_v60  ;;  %v2529_v61 = vld [vmem:[#allocation7 + $0xd0] sm:$0xff]  ;;  %v2533_v62 = vld [vmem:[#allocation7] sm:$0xff]  ;;  %v2535_v63 = vld [vmem:[#allocation7 + $0xb8] sm:$0xff] }
  0x4a   :  { %355 = vmatpush1.msra.mxu0 %v2461_v38  ;;  %415 = vmatprep.subr.mxu1 %v2463_v39  ;;  %3385 = vst [vmem:[#allocation26_spill] sm:$0xff] %v2533_v62  ;;  %v2539_v1 = vld [vmem:[#allocation7 + $0xb0] sm:$0xff]  ;;  %v2543_v3 = vld [vmem:[#allocation7 + $0x98] sm:$0xff] }
  0x4b   :  { %356 = vmatprep.subr.mxu0 %v2467_v40  ;;  %416 = vmatpush1.msra.mxu1 %v2469_v41  ;;  %3386 = vst [vmem:[#allocation27_spill] sm:$0xff] %v2543_v3  ;;  %v2547_v5 = vld [vmem:[#allocation7 + $0x90] sm:$0xff]  ;;  %v2551_v7 = vld [vmem:[#allocation7 + $0x78] sm:$0xff] }
  0x4c   :  { %357 = vmatpush1.msra.mxu0 %v2473_v42  ;;  %417 = vmatprep.subr.mxu1 %v2475_v43  ;;  %3387 = vst [vmem:[#allocation28_spill] sm:$0xff] %v2547_v5  ;;  %3388 = vst [vmem:[#allocation29_spill] sm:$0xff] %v2551_v7  ;;  %v2554_v9 = vld [vmem:[#allocation7 + $0x70] sm:$0xff]  ;;  %v2558_v13 = vld [vmem:[#allocation7 + $0x58] sm:$0xff] }
  0x4d   :  { %358 = vmatprep.subr.mxu0 %v2479_v44  ;;  %418 = vmatpush1.msra.mxu1 %v2481_v45  ;;  %3389 = vst [vmem:[#allocation30_spill] sm:$0xff] %v2554_v9  ;;  %3390 = vst [vmem:[#allocation31_spill] sm:$0xff] %v2558_v13  ;;  %v2562_v15 = vld [vmem:[#allocation7 + $0x50] sm:$0xff]  ;;  %v2567_v18 = vld [vmem:[#allocation7 + $0x38] sm:$0xff] }
  0x4e   :  { %359 = vmatpush1.msra.mxu0 %v2485_v46  ;;  %419 = vmatprep.subr.mxu1 %v2487_v47  ;;  %3391 = vst [vmem:[#allocation32_spill] sm:$0xff] %v2562_v15  ;;  %3392 = vst [vmem:[#allocation33_spill] sm:$0xff] %v2567_v18  ;;  %v2571_v20 = vld [vmem:[#allocation7 + $0x30] sm:$0xff] }
  0x4f   :  { %360 = vmatprep.subr.mxu0 %v2491_v48  ;;  %420 = vmatpush1.msra.mxu1 %v2493_v49  ;;  %3393 = vst [vmem:[#allocation34_spill] sm:$0xff] %v2571_v20 }
  0x50   :  { %361 = vmatpush1.msra.mxu0 %v2497_v50  ;;  %421 = vmatprep.subr.mxu1 %v2499_v51 }
  0x51   :  { %362 = vmatprep.subr.mxu0 %v2503_v52  ;;  %422 = vmatpush1.msra.mxu1 %v2505_v53 }
  0x52   :  { %363 = vmatpush1.msra.mxu0 %v2509_v54  ;;  %423 = vmatprep.subr.mxu1 %v2511_v55 }
  0x53   :  { %364 = vmatprep.subr.mxu0 %v2515_v56  ;;  %424 = vmatpush1.msra.mxu1 %v2517_v57 }
  0x54   :  { %365 = vmatpush1.msra.mxu0 %v2521_v58  ;;  %425 = vmatprep.subr.mxu1 %v2523_v59 }
  0x55   :  { %366 = vmatprep.subr.mxu0 %v2527_v60  ;;  %426 = vmatpush1.msra.mxu1 %v2529_v61 }
  0x56   :  { %367 = vmatpush1.msra.mxu0 %v2533_v62  ;;  %427 = vmatprep.subr.mxu1 %v2535_v63 }
  0x57   :  { %401 = vmatmul.mubr.f32.vlgmr.msra.gmra.mxu0 %v3293_v0  ;;  %428 = vmatpush1.msra.mxu1 %v2539_v1 }
  0x58   :  { %429 = vmatprep.subr.mxu1 %v2543_v3  ;;  %265 = vmatprep.mubr.f32.mxu1 %v3293_v0 }
  0x59   :  { %430 = vmatpush1.msra.mxu1 %v2547_v5  ;;  %506 = vmatprep.subr.mxu0 %v2376_v2  ;;  %v2575_v2 = vld [vmem:[#allocation7 + $0x18] sm:$0xff] }
  0x5a   :  { %431 = vmatprep.subr.mxu1 %v2551_v7  ;;  %1921 = vmatmul.mubr.msk.f32.gmra.mxu1 %vm111_vm0, %v2400_v16  ;;  %3394 = vst [vmem:[#allocation35_spill] sm:$0xff] %v2575_v2  ;;  %v2579_v16 = vld [vmem:[#allocation7 + $0x10] sm:$0xff] }
  0x5b   :  { %432 = vmatpush1.msra.mxu1 %v2554_v9  ;;  %471 = vmatprep.mubr.f32.mxu1 %v3293_v0  ;;  %3395 = vst [vmem:[#allocation36_spill] sm:$0xff] %v2579_v16 }
  0x5c   :  { %433 = vmatprep.subr.mxu1 %v2558_v13  ;;  %507 = vmatpush1.msra.mxu0 %v2379_v4 }
  0x5d   :  { %434 = vmatpush1.msra.mxu1 %v2562_v15  ;;  %508 = vmatprep.subr.mxu0 %v2381_v6 }
  0x5e   :  { %435 = vmatprep.subr.mxu1 %v2567_v18  ;;  %509 = vmatpush1.msra.mxu0 %v2384_v8 }
  0x5f   :  { %436 = vmatpush1.msra.mxu1 %v2571_v20  ;;  %510 = vmatprep.subr.mxu0 %v2387_v10 }
  0x60   :  { %437 = vmatprep.subr.mxu1 %v2575_v2  ;;  %511 = vmatpush1.msra.mxu0 %v2389_v11 }
  0x61   :  { %438 = vmatpush1.msra.mxu1 %v2579_v16  ;;  %512 = vmatprep.subr.mxu0 %v2392_v12 }
  0x62   :  { %472 = vmatmul.mubr.f32.vlgmr.msra.gmra.mxu1 %v3293_v0  ;;  %577 = vmatprep.subr.mxu1 %v2416_v23 }
  0x63   :  { %578 = vmatpush1.msra.mxu1 %v2421_v25  ;;  %513 = vmatpush1.msra.mxu0 %v2396_v14 }
  0x64   :  { %579 = vmatprep.subr.mxu1 %v2427_v27  ;;  %514 = vmatprep.subr.mxu0 %v2402_v17 }
  0x65   :  { %580 = vmatpush1.msra.mxu1 %v2433_v29  ;;  %515 = vmatpush1.msra.mxu0 %v2405_v19 }
  0x66   :  { %581 = vmatprep.subr.mxu1 %v2439_v31  ;;  %516 = vmatprep.subr.mxu0 %v2408_v21 }
  0x67   :  { %582 = vmatpush1.msra.mxu1 %v2445_v33  ;;  %517 = vmatpush1.msra.mxu0 %v2413_v22 }
  0x68   :  { %583 = vmatprep.subr.mxu1 %v2451_v35  ;;  %518 = vmatprep.subr.mxu0 %v2419_v24 }
  0x69   :  { %584 = vmatpush1.msra.mxu1 %v2457_v37  ;;  %519 = vmatpush1.msra.mxu0 %v2425_v26 }
  0x6a   :  { %585 = vmatprep.subr.mxu1 %v2463_v39  ;;  %520 = vmatprep.subr.mxu0 %v2431_v28 }
  0x6b   :  { %586 = vmatpush1.msra.mxu1 %v2469_v41  ;;  %521 = vmatpush1.msra.mxu0 %v2437_v30 }
  0x6c   :  { %587 = vmatprep.subr.mxu1 %v2475_v43  ;;  %522 = vmatprep.subr.mxu0 %v2443_v32 }
  0x6d   :  { %588 = vmatpush1.msra.mxu1 %v2481_v45  ;;  %523 = vmatpush1.msra.mxu0 %v2449_v34 }
  0x6e   :  { %589 = vmatprep.subr.mxu1 %v2487_v47  ;;  %524 = vmatprep.subr.mxu0 %v2455_v36 }
  0x6f   :  { %590 = vmatpush1.msra.mxu1 %v2493_v49  ;;  %525 = vmatpush1.msra.mxu0 %v2461_v38 }
  0x70   :  { %591 = vmatprep.subr.mxu1 %v2499_v51  ;;  %526 = vmatprep.subr.mxu0 %v2467_v40 }
  0x71   :  { %592 = vmatpush1.msra.mxu1 %v2505_v53  ;;  %527 = vmatpush1.msra.mxu0 %v2473_v42 }
  0x72   :  { %593 = vmatprep.subr.mxu1 %v2511_v55  ;;  %528 = vmatprep.subr.mxu0 %v2479_v44 }
  0x73   :  { %594 = vmatpush1.msra.mxu1 %v2517_v57  ;;  %529 = vmatpush1.msra.mxu0 %v2485_v46 }
  0x74   :  { %595 = vmatprep.subr.mxu1 %v2523_v59  ;;  %530 = vmatprep.subr.mxu0 %v2491_v48 }
  0x75   :  { %596 = vmatpush1.msra.mxu1 %v2529_v61  ;;  %531 = vmatpush1.msra.mxu0 %v2497_v50 }
  0x76   :  { %597 = vmatprep.subr.mxu1 %v2535_v63  ;;  %532 = vmatprep.subr.mxu0 %v2503_v52 }
  0x77   :  { %598 = vmatpush1.msra.mxu1 %v2539_v1  ;;  %533 = vmatpush1.msra.mxu0 %v2509_v54 }
  0x78   :  { %599 = vmatprep.subr.mxu1 %v2543_v3  ;;  %534 = vmatprep.subr.mxu0 %v2515_v56  ;;  %v3396_v56 = vld [vmem:[#allocation15_spill] sm:$0xff] }
  0x79   :  { %600 = vmatpush1.msra.mxu1 %v2547_v5  ;;  %535 = vmatpush1.msra.mxu0 %v2521_v58 }
  0x7a   :  { %601 = vmatprep.subr.mxu1 %v2551_v7  ;;  %536 = vmatprep.subr.mxu0 %v2527_v60 }
  0x7b   :  { %602 = vmatpush1.msra.mxu1 %v2554_v9  ;;  %537 = vmatpush1.msra.mxu0 %v2533_v62  ;;  %v91_v62 = vlaneseq }
  0x7c   :  { %603 = vmatprep.subr.mxu1 %v2558_v13  ;;  %570 = vmatprep.mubr.f32.mxu0 %v3293_v0 }
  0x7d   :  { %604 = vmatpush1.msra.mxu1 %v2562_v15  ;;  %641 = vmatprep.mubr.f32.mxu1 %v3293_v0  ;;  %v92_v60 = vshrl.u32 %v91_v62, 7  ;;  %v89_v15 = vld [vmem:[%s3277_s3] sm:$0xf] }
  0x7e   :  { %605 = vmatprep.subr.mxu1 %v2567_v18  ;;  %694 = vmatprep.subr.mxu0 %v3396_v56 }
  0x7f   :  { %606 = vmatpush1.msra.mxu1 %v2571_v20  ;;  %v93_v58 = vsub.s32 0, %v92_v60  ;;  %v97_v54 = vsub.s32 1, %v92_v60  ;;  %v105_v62 = vsub.s32 3, %v92_v60 }
  0x80   :  { %607 = vmatprep.subr.mxu1 %v2575_v2 }
  0x81   :  { %608 = vmatpush1.msra.mxu1 %v2579_v16  ;;  %v94_v13 = vrot.slane %v89_v15, %v93_v58  ;;  %v98_v52 = vrot.slane %v89_v15, %v97_v54 }
  0x82   :  { %765 = vmatprep.subr.mxu1 %v2416_v23  ;;  %v101_v23 = vsub.s32 2, %v92_v60 }
  0x84   :  { %v102_v3 = vrot.slane %v89_v15, %v101_v23 }
  0xfa   :  { %v184_v0 = vpop.f32.mrf.mxu1 }
  0xfb   :  { %v2657_v50 = vadd.f32 %v184_v0, %v94_v13 }
  0xfc   :  { %v186_v18 = vpop.f32.mrf.mxu1 }
  0xfd   :  { %v2659_v48 = vadd.f32 %v186_v18, %v98_v52 }
  0xfe   :  { %v190_v56 = vpop.f32.mrf.mxu1 }
  0xff   :  { %v2653_v20 = vadd.f32 %v190_v56, %v94_v13 }
 0x100   :  { %v192_v2 = vpop.f32.mrf.mxu1 }
 0x101   :  { %3397 = vst [vmem:[#allocation37_spill] sm:$0xff] %v2653_v20  ;;  %v2655_v9 = vadd.f32 %v192_v2, %v98_v52  ;;  %v106_v20 = vrot.slane %v89_v15, %v105_v62 }
 0x102   :  { %v261_v16 = vpop.f32.mrf.mxu1 }
 0x103   :  { %3398 = vst [vmem:[#allocation38_spill] sm:$0xff] %v2655_v9 }
 0x104   :  { %v263_v5 = vpop.f32.mrf.mxu1 }
 0x105   :  { %v2667_v60 = vadd.f32 %v263_v5, %v106_v20 }
 0x117   :  { %v402_v7 = vpop.f32.mrf.mxu0 }
 0x118   :  { %v478_v46 = vadd.f32 %v402_v7, %v2657_v50  ;;  %v2670_v7 = vadd.f32 %v261_v16, %v102_v3 }
 0x119   :  { %v404_v58 = vpop.f32.mrf.mxu0 }
 0x11a   :  { %v1922_v44 = vmul.f32 -1.442695, %v478_v46  ;;  %v479_v54 = vadd.f32 %v404_v58, %v2659_v48  ;;  %v267_v56 = vpop.f32.mrf.mxu1 }
 0x11b   :  { %v2663_v2 = vadd.f32 %v267_v56, %v102_v3 }
 0x11c   :  { %2010 = vpow2.f32 %v1922_v44  ;;  %v1923_v9 = vmul.f32 -1.442695, %v479_v54  ;;  %v269_v0 = vpop.f32.mrf.mxu1 }
 0x11d   :  { %3399 = vst [vmem:[#allocation39_spill] sm:$0xff] %v2663_v2  ;;  %v2665_v13 = vadd.f32 %v269_v0, %v106_v20 }
 0x11e   :  { %2012 = vpow2.f32 %v1923_v9 }
 0x11f   :  { %3400 = vst [vmem:[#allocation40_spill] sm:$0xff] %v2665_v13  ;;  %v3417_v13 = vld [vmem:[#allocation25_spill] sm:$0xff] }
 0x122   :  { %v473_v52 = vpop.f32.mrf.mxu1 }
 0x123   :  { %v480_v15 = vadd.f32 %v473_v52, %v2670_v7 }
 0x124   :  { %v475_v18 = vpop.f32.mrf.mxu1 }
 0x125   :  { %v481_v23 = vadd.f32 %v475_v18, %v2667_v60 }
 0x127   :  { %v1924_v46 = vmul.f32 -1.442695, %v481_v23 }
 0x129   :  { %v2011_v58 = vpop.eup %2010  ;;  %2014 = vpow2.f32 %v1924_v46  ;;  %v3402_v46 = vld [vmem:[#allocation27_spill] sm:$0xff] }
 0x12a   :  { %v485_v62 = vadd.f32 1.0, %v2011_v58  ;;  %v3403_v58 = vld [vmem:[#allocation18_spill] sm:$0xff] }
 0x12b   :  { %v2013_v56 = vpop.eup %2012 }
 0x12c   :  { %2016 = vrcp.f32 %v485_v62  ;;  %v491_v44 = vadd.f32 1.0, %v2013_v56  ;;  %v3405_v62 = vld [vmem:[#allocation19_spill] sm:$0xff]  ;;  %v3406_v56 = vld [vmem:[#allocation29_spill] sm:$0xff] }
 0x12d   :  { %2018 = vtanh.f32 %v480_v15  ;;  %v3404_v15 = vld [vmem:[#allocation28_spill] sm:$0xff] }
 0x12e   :  { %2020 = vrcp.f32 %v491_v44  ;;  %v3407_v44 = vld [vmem:[#allocation20_spill] sm:$0xff] }
 0x136   :  { %v2015_v9 = vpop.eup %2014 }
 0x137   :  { %v498_v0 = vadd.f32 1.0, %v2015_v9  ;;  %v3408_v9 = vld [vmem:[#allocation30_spill] sm:$0xff] }
 0x139   :  { %v2017_v54 = vpop.eup %2016  ;;  %2022 = vrcp.f32 %v498_v0  ;;  %v3412_v0 = vld [vmem:[#allocation32_spill] sm:$0xff] }
 0x13a   :  { %v2019_v5 = vpop.eup %2018 }
 0x13b   :  { %v2021_v20 = vpop.eup %2020  ;;  %v502_v18 = vmul.f32 %v2019_v5, %v2017_v54  ;;  %v3409_v54 = vld [vmem:[#allocation21_spill] sm:$0xff]  ;;  %v3410_v5 = vld [vmem:[#allocation31_spill] sm:$0xff] }
 0x13c   :  { %v501_v2 = vmul.f32 0.0, %v2021_v20  ;;  %v3411_v20 = vld [vmem:[#allocation22_spill] sm:$0xff] }
 0x13e   :  { %v2673_v3 = vadd.f32 %v502_v18, %v501_v2  ;;  %v3401_v2 = vld [vmem:[#allocation17_spill] sm:$0xff]  ;;  %v3413_v18 = vld [vmem:[#allocation23_spill] sm:$0xff] }
 0x140   :  { %2024 = vtanh.f32 %v2673_v3 }
 0x146   :  { %v2023_v16 = vpop.eup %2022 }
 0x14d   :  { %v2025_v52 = vpop.eup %2024 }
 0x14e   :  { %v505_v23 = vmul.f32 %v2025_v52, %v2023_v16  ;;  %v3414_v16 = vld [vmem:[#allocation33_spill] sm:$0xff]  ;;  %v3415_v52 = vld [vmem:[#allocation24_spill] sm:$0xff] }
 0x150   :  { %571 = vmatmul.mubr.f32.vlgmr.msra.gmra.mxu0 %v505_v23  ;;  %642 = vmatmul.mubr.f32.vlgmr.msra.gmra.mxu1 %v505_v23  ;;  %v3416_v23 = vld [vmem:[#allocation34_spill] sm:$0xff] }
 0x151   :  { %695 = vmatpush1.msra.mxu0 %v2379_v4  ;;  %766 = vmatpush1.msra.mxu1 %v2421_v25 }
 0x152   :  { %696 = vmatprep.subr.mxu0 %v2381_v6  ;;  %767 = vmatprep.subr.mxu1 %v2427_v27 }
 0x153   :  { %697 = vmatpush1.msra.mxu0 %v2384_v8  ;;  %768 = vmatpush1.msra.mxu1 %v2433_v29 }
 0x154   :  { %698 = vmatprep.subr.mxu0 %v2387_v10  ;;  %769 = vmatprep.subr.mxu1 %v2439_v31 }
 0x155   :  { %699 = vmatpush1.msra.mxu0 %v2389_v11  ;;  %770 = vmatpush1.msra.mxu1 %v2445_v33 }
 0x156   :  { %700 = vmatprep.subr.mxu0 %v2392_v12  ;;  %771 = vmatprep.subr.mxu1 %v2451_v35 }
 0x157   :  { %701 = vmatpush1.msra.mxu0 %v2396_v14  ;;  %772 = vmatpush1.msra.mxu1 %v2457_v37 }
 0x158   :  { %702 = vmatprep.subr.mxu0 %v2402_v17  ;;  %773 = vmatprep.subr.mxu1 %v2463_v39 }
 0x159   :  { %703 = vmatpush1.msra.mxu0 %v2405_v19  ;;  %774 = vmatpush1.msra.mxu1 %v2469_v41 }
 0x15a   :  { %704 = vmatprep.subr.mxu0 %v2408_v21  ;;  %775 = vmatprep.subr.mxu1 %v2475_v43 }
 0x15b   :  { %705 = vmatpush1.msra.mxu0 %v2413_v22  ;;  %776 = vmatpush1.msra.mxu1 %v2481_v45 }
 0x15c   :  { %706 = vmatprep.subr.mxu0 %v2419_v24  ;;  %777 = vmatprep.subr.mxu1 %v2487_v47 }
 0x15d   :  { %707 = vmatpush1.msra.mxu0 %v2425_v26  ;;  %778 = vmatpush1.msra.mxu1 %v2493_v49 }
 0x15e   :  { %708 = vmatprep.subr.mxu0 %v2431_v28  ;;  %779 = vmatprep.subr.mxu1 %v2499_v51 }
 0x15f   :  { %709 = vmatpush1.msra.mxu0 %v2437_v30  ;;  %780 = vmatpush1.msra.mxu1 %v2505_v53 }
 0x160   :  { %710 = vmatprep.subr.mxu0 %v2443_v32  ;;  %781 = vmatprep.subr.mxu1 %v2511_v55 }
 0x161   :  { %711 = vmatpush1.msra.mxu0 %v2449_v34  ;;  %782 = vmatpush1.msra.mxu1 %v2517_v57 }
 0x162   :  { %712 = vmatprep.subr.mxu0 %v2455_v36  ;;  %783 = vmatprep.subr.mxu1 %v2523_v59 }
 0x163   :  { %713 = vmatpush1.msra.mxu0 %v2461_v38  ;;  %784 = vmatpush1.msra.mxu1 %v2529_v61 }
 0x164   :  { %714 = vmatprep.subr.mxu0 %v2467_v40  ;;  %785 = vmatprep.subr.mxu1 %v2535_v63 }
 0x165   :  { %715 = vmatpush1.msra.mxu0 %v2473_v42  ;;  %786 = vmatpush1.msra.mxu1 %v2539_v1 }
 0x166   :  { %716 = vmatprep.subr.mxu0 %v3401_v2  ;;  %787 = vmatprep.subr.mxu1 %v3402_v46 }
 0x167   :  { %717 = vmatpush1.msra.mxu0 %v3403_v58  ;;  %788 = vmatpush1.msra.mxu1 %v3404_v15 }
 0x168   :  { %718 = vmatprep.subr.mxu0 %v3405_v62  ;;  %789 = vmatprep.subr.mxu1 %v3406_v56 }
 0x169   :  { %719 = vmatpush1.msra.mxu0 %v3407_v44  ;;  %790 = vmatpush1.msra.mxu1 %v3408_v9  ;;  %v3418_v44 = vld [vmem:[#allocation35_spill] sm:$0xff]  ;;  %v3419_v9 = vld [vmem:[#allocation26_spill] sm:$0xff] }
 0x16a   :  { %720 = vmatprep.subr.mxu0 %v3409_v54  ;;  %791 = vmatprep.subr.mxu1 %v3410_v5  ;;  %v3420_v54 = vmov 0.0   ;;  %v3421_v5 = vld [vmem:[#allocation36_spill] sm:$0xff] }
 0x16b   :  { %721 = vmatpush1.msra.mxu0 %v3411_v20  ;;  %792 = vmatpush1.msra.mxu1 %v3412_v0  ;;  %v3422_v0 = vld [vmem:[#allocation15_spill] sm:$0xff] }
 0x16c   :  { %722 = vmatprep.subr.mxu0 %v3413_v18  ;;  %793 = vmatprep.subr.mxu1 %v3414_v16  ;;  %v3423_v18 = vld [vmem:[#allocation16_spill] sm:$0xff] }
 0x16d   :  { %723 = vmatpush1.msra.mxu0 %v3415_v52  ;;  %794 = vmatpush1.msra.mxu1 %v3416_v23 }
 0x16e   :  { %724 = vmatprep.subr.mxu0 %v3417_v13  ;;  %795 = vmatprep.subr.mxu1 %v3418_v44 }
 0x16f   :  { %725 = vmatpush1.msra.mxu0 %v3419_v9  ;;  %758 = vmatprep.mubr.f32.mxu0 %v3420_v54 }
 0x170   :  { %796 = vmatpush1.msra.mxu1 %v3421_v5  ;;  %829 = vmatprep.mubr.f32.mxu1 %v3420_v54 }
 0x171   :  { %882 = vmatprep.subr.mxu0 %v3422_v0  ;;  %953 = vmatprep.subr.mxu1 %v3423_v18 }
 0x210   :  { %v572_v16 = vpop.f32.mrf.mxu0  ;;  %v643_v13 = vpop.f32.mrf.mxu1 }
 0x211   :  { %v652_v52 = vrot.slane %v572_v16, 6  ;;  %v654_v0 = vrot.slane %v643_v13, 6 }
 0x212   :  { %v574_v20 = vpop.f32.mrf.mxu0  ;;  %v645_v15 = vpop.f32.mrf.mxu1 }
 0x213   :  { %v660_v23 = vadd.f32 %v652_v52, %v2657_v50  ;;  %v653_v56 = vrot.slane %v574_v20, 6  ;;  %v655_v5 = vrot.slane %v645_v15, 6  ;;  %v662_v16 = vadd.f32 %v654_v0, %v2670_v7 }
 0x215   :  { %v1925_v44 = vmul.f32 -1.442695, %v660_v23  ;;  %v661_v9 = vadd.f32 %v653_v56, %v2659_v48  ;;  %v663_v54 = vadd.f32 %v655_v5, %v2667_v60  ;;  %v3426_v23 = vld [vmem:[#allocation18_spill] sm:$0xff] }
 0x217   :  { %2026 = vpow2.f32 %v1925_v44  ;;  %v1926_v62 = vmul.f32 -1.442695, %v661_v9  ;;  %v1927_v58 = vmul.f32 -1.442695, %v663_v54 }
 0x219   :  { %2028 = vpow2.f32 %v1926_v62  ;;  %v684_v62 = vrot.slane %v2673_v3, 6  ;;  %v3424_v3 = vld [vmem:[#allocation17_spill] sm:$0xff] }
 0x21a   :  { %2030 = vpow2.f32 %v1927_v58 }
 0x224   :  { %v2027_v18 = vpop.eup %2026 }
 0x225   :  { %v667_v46 = vadd.f32 1.0, %v2027_v18  ;;  %v3425_v18 = vld [vmem:[#allocation27_spill] sm:$0xff] }
 0x226   :  { %v2029_v2 = vpop.eup %2028 }
 0x227   :  { %2032 = vrcp.f32 %v667_v46  ;;  %v673_v20 = vadd.f32 1.0, %v2029_v2  ;;  %v2031_v56 = vpop.eup %2030 }
 0x228   :  { %2034 = vtanh.f32 %v662_v16  ;;  %v680_v52 = vadd.f32 1.0, %v2031_v56  ;;  %v3427_v16 = vld [vmem:[#allocation28_spill] sm:$0xff]  ;;  %v3429_v56 = vld [vmem:[#allocation29_spill] sm:$0xff] }
 0x229   :  { %2036 = vrcp.f32 %v673_v20  ;;  %v3428_v20 = vld [vmem:[#allocation19_spill] sm:$0xff] }
 0x22a   :  { %2038 = vrcp.f32 %v680_v52  ;;  %v3434_v52 = vld [vmem:[#allocation22_spill] sm:$0xff] }
 0x234   :  { %v2033_v44 = vpop.eup %2032 }
 0x235   :  { %v2035_v9 = vpop.eup %2034 }
 0x236   :  { %v2037_v15 = vpop.eup %2036  ;;  %v687_v5 = vmul.f32 %v2035_v9, %v2033_v44  ;;  %v3430_v44 = vld [vmem:[#allocation20_spill] sm:$0xff]  ;;  %v3431_v9 = vld [vmem:[#allocation30_spill] sm:$0xff] }
 0x237   :  { %v686_v13 = vmul.f32 %v2037_v15, %v684_v62  ;;  %v2039_v0 = vpop.eup %2038  ;;  %v3432_v62 = vld [vmem:[#allocation21_spill] sm:$0xff]  ;;  %v3433_v15 = vld [vmem:[#allocation31_spill] sm:$0xff] }
 0x239   :  { %v2747_v54 = vadd.f32 %v687_v5, %v686_v13  ;;  %v3435_v5 = vld [vmem:[#allocation32_spill] sm:$0xff]  ;;  %v3436_v13 = vld [vmem:[#allocation23_spill] sm:$0xff] }
 0x23b   :  { %2040 = vtanh.f32 %v2747_v54 }
 0x248   :  { %v2041_v58 = vpop.eup %2040 }
 0x249   :  { %v690_v46 = vmul.f32 %v2041_v58, %v2039_v0  ;;  %v3437_v0 = vld [vmem:[#allocation33_spill] sm:$0xff]  ;;  %v3438_v58 = vld [vmem:[#allocation24_spill] sm:$0xff] }
 0x24b   :  { %v692_v2 = vrot.slane %v690_v46, 2  ;;  %v3439_v46 = vld [vmem:[#allocation34_spill] sm:$0xff] }
 0x24d   :  { %759 = vmatmul.mubr.f32.vlgmr.msra.gmra.mxu0 %v692_v2  ;;  %830 = vmatmul.mubr.f32.vlgmr.msra.gmra.mxu1 %v692_v2  ;;  %v3440_v2 = vld [vmem:[#allocation25_spill] sm:$0xff] }
 0x24e   :  { %883 = vmatpush1.msra.mxu0 %v2379_v4  ;;  %954 = vmatpush1.msra.mxu1 %v2421_v25 }
 0x24f   :  { %884 = vmatprep.subr.mxu0 %v2381_v6  ;;  %955 = vmatprep.subr.mxu1 %v2427_v27 }
 0x250   :  { %885 = vmatpush1.msra.mxu0 %v2384_v8  ;;  %956 = vmatpush1.msra.mxu1 %v2433_v29 }
 0x251   :  { %886 = vmatprep.subr.mxu0 %v2387_v10  ;;  %957 = vmatprep.subr.mxu1 %v2439_v31 }
 0x252   :  { %887 = vmatpush1.msra.mxu0 %v2389_v11  ;;  %958 = vmatpush1.msra.mxu1 %v2445_v33 }
 0x253   :  { %888 = vmatprep.subr.mxu0 %v2392_v12  ;;  %959 = vmatprep.subr.mxu1 %v2451_v35 }
 0x254   :  { %889 = vmatpush1.msra.mxu0 %v2396_v14  ;;  %960 = vmatpush1.msra.mxu1 %v2457_v37 }
 0x255   :  { %890 = vmatprep.subr.mxu0 %v2402_v17  ;;  %961 = vmatprep.subr.mxu1 %v2463_v39 }
 0x256   :  { %891 = vmatpush1.msra.mxu0 %v2405_v19  ;;  %962 = vmatpush1.msra.mxu1 %v2469_v41 }
 0x257   :  { %892 = vmatprep.subr.mxu0 %v2408_v21  ;;  %963 = vmatprep.subr.mxu1 %v2475_v43 }
 0x258   :  { %893 = vmatpush1.msra.mxu0 %v2413_v22  ;;  %964 = vmatpush1.msra.mxu1 %v2481_v45 }
 0x259   :  { %894 = vmatprep.subr.mxu0 %v2419_v24  ;;  %965 = vmatprep.subr.mxu1 %v2487_v47 }
 0x25a   :  { %895 = vmatpush1.msra.mxu0 %v2425_v26  ;;  %966 = vmatpush1.msra.mxu1 %v2493_v49 }
 0x25b   :  { %896 = vmatprep.subr.mxu0 %v2431_v28  ;;  %967 = vmatprep.subr.mxu1 %v2499_v51 }
 0x25c   :  { %897 = vmatpush1.msra.mxu0 %v2437_v30  ;;  %968 = vmatpush1.msra.mxu1 %v2505_v53 }
 0x25d   :  { %898 = vmatprep.subr.mxu0 %v2443_v32  ;;  %969 = vmatprep.subr.mxu1 %v2511_v55 }
 0x25e   :  { %899 = vmatpush1.msra.mxu0 %v2449_v34  ;;  %970 = vmatpush1.msra.mxu1 %v2517_v57 }
 0x25f   :  { %900 = vmatprep.subr.mxu0 %v2455_v36  ;;  %971 = vmatprep.subr.mxu1 %v2523_v59 }
 0x260   :  { %901 = vmatpush1.msra.mxu0 %v2461_v38  ;;  %972 = vmatpush1.msra.mxu1 %v2529_v61 }
 0x261   :  { %902 = vmatprep.subr.mxu0 %v2467_v40  ;;  %973 = vmatprep.subr.mxu1 %v2535_v63 }
 0x262   :  { %903 = vmatpush1.msra.mxu0 %v2473_v42  ;;  %974 = vmatpush1.msra.mxu1 %v2539_v1 }
 0x263   :  { %904 = vmatprep.subr.mxu0 %v3424_v3  ;;  %975 = vmatprep.subr.mxu1 %v3425_v18 }
 0x264   :  { %905 = vmatpush1.msra.mxu0 %v3426_v23  ;;  %976 = vmatpush1.msra.mxu1 %v3427_v16 }
 0x265   :  { %906 = vmatprep.subr.mxu0 %v3428_v20  ;;  %977 = vmatprep.subr.mxu1 %v3429_v56 }
 0x266   :  { %907 = vmatpush1.msra.mxu0 %v3430_v44  ;;  %978 = vmatpush1.msra.mxu1 %v3431_v9  ;;  %v3441_v44 = vld [vmem:[#allocation35_spill] sm:$0xff]  ;;  %v3442_v9 = vld [vmem:[#allocation26_spill] sm:$0xff] }
 0x267   :  { %908 = vmatprep.subr.mxu0 %v3432_v62  ;;  %979 = vmatprep.subr.mxu1 %v3433_v15  ;;  %v3443_v62 = vmov 0.0   ;;  %v3444_v15 = vld [vmem:[#allocation36_spill] sm:$0xff] }
 0x268   :  { %909 = vmatpush1.msra.mxu0 %v3434_v52  ;;  %980 = vmatpush1.msra.mxu1 %v3435_v5  ;;  %v3445_v5 = vld [vmem:[#allocation15_spill] sm:$0xff] }
 0x269   :  { %910 = vmatprep.subr.mxu0 %v3436_v13  ;;  %981 = vmatprep.subr.mxu1 %v3437_v0  ;;  %v3446_v13 = vld [vmem:[#allocation16_spill] sm:$0xff] }
 0x26a   :  { %911 = vmatpush1.msra.mxu0 %v3438_v58  ;;  %982 = vmatpush1.msra.mxu1 %v3439_v46 }
 0x26b   :  { %912 = vmatprep.subr.mxu0 %v3440_v2  ;;  %983 = vmatprep.subr.mxu1 %v3441_v44 }
 0x26c   :  { %913 = vmatpush1.msra.mxu0 %v3442_v9  ;;  %946 = vmatprep.mubr.f32.mxu0 %v3443_v62 }
 0x26d   :  { %984 = vmatpush1.msra.mxu1 %v3444_v15  ;;  %1017 = vmatprep.mubr.f32.mxu1 %v3443_v62 }
 0x26e   :  { %1070 = vmatprep.subr.mxu0 %v3445_v5  ;;  %1141 = vmatprep.subr.mxu1 %v3446_v13 }
 0x30d   :  { %v760_v0 = vpop.f32.mrf.mxu0  ;;  %v831_v2 = vpop.f32.mrf.mxu1 }
 0x30e   :  { %v840_v58 = vrot.slane %v760_v0, 4  ;;  %v842_v5 = vrot.slane %v831_v2, 4 }
 0x30f   :  { %v762_v52 = vpop.f32.mrf.mxu0  ;;  %v833_v16 = vpop.f32.mrf.mxu1 }
 0x310   :  { %v848_v46 = vadd.f32 %v840_v58, %v2657_v50  ;;  %v841_v56 = vrot.slane %v762_v52, 4  ;;  %v843_v15 = vrot.slane %v833_v16, 4  ;;  %v850_v0 = vadd.f32 %v842_v5, %v2670_v7 }
 0x312   :  { %v1928_v44 = vmul.f32 -1.442695, %v848_v46  ;;  %v849_v9 = vadd.f32 %v841_v56, %v2659_v48  ;;  %v851_v62 = vadd.f32 %v843_v15, %v2667_v60 }
 0x314   :  { %2042 = vpow2.f32 %v1928_v44  ;;  %v1929_v20 = vmul.f32 -1.442695, %v849_v9  ;;  %v1930_v23 = vmul.f32 -1.442695, %v851_v62 }
 0x316   :  { %2044 = vpow2.f32 %v1929_v20  ;;  %v872_v20 = vrot.slane %v2747_v54, 6 }
 0x317   :  { %2046 = vpow2.f32 %v1930_v23 }
 0x321   :  { %v2043_v13 = vpop.eup %2042 }
 0x322   :  { %v855_v18 = vadd.f32 1.0, %v2043_v13 }
 0x323   :  { %v2045_v3 = vpop.eup %2044 }
 0x324   :  { %2048 = vrcp.f32 %v855_v18  ;;  %v861_v52 = vadd.f32 1.0, %v2045_v3  ;;  %v2047_v56 = vpop.eup %2046 }
 0x325   :  { %2050 = vtanh.f32 %v850_v0  ;;  %v868_v58 = vadd.f32 1.0, %v2047_v56 }
 0x326   :  { %2052 = vrcp.f32 %v861_v52 }
 0x327   :  { %2054 = vrcp.f32 %v868_v58  ;;  %v2905_v58 = vld [vmem:[#allocation7 + $0x1f0] sm:$0xff] }
 0x331   :  { %v2049_v44 = vpop.eup %2048 }
 0x332   :  { %v2051_v9 = vpop.eup %2050 }
 0x333   :  { %v2053_v16 = vpop.eup %2052  ;;  %v875_v15 = vmul.f32 %v2051_v9, %v2049_v44 }
 0x334   :  { %v874_v46 = vmul.f32 %v2053_v16, %v872_v20  ;;  %v2055_v2 = vpop.eup %2054  ;;  %v2902_v16 = vld [vmem:[#allocation7 + $0x1e0] sm:$0xff] }
 0x336   :  { %v2821_v62 = vadd.f32 %v875_v15, %v874_v46  ;;  %v2908_v15 = vld [vmem:[#allocation7 + $0x1c8] sm:$0xff]  ;;  %v2911_v46 = vld [vmem:[#allocation7 + $0x1d8] sm:$0xff] }
 0x338   :  { %2056 = vtanh.f32 %v2821_v62  ;;  %v1060_v5 = vrot.slane %v2821_v62, 6  ;;  %v2914_v62 = vld [vmem:[#allocation7 + $0x1c0] sm:$0xff] }
 0x345   :  { %v2057_v23 = vpop.eup %2056 }
 0x346   :  { %v878_v18 = vmul.f32 %v2057_v23, %v2055_v2  ;;  %v2917_v2 = vld [vmem:[#allocation7 + $0x1d0] sm:$0xff]  ;;  %v2920_v23 = vld [vmem:[#allocation7 + $0x1a8] sm:$0xff] }
 0x348   :  { %v880_v3 = vrot.slane %v878_v18, 4  ;;  %v2923_v18 = vld [vmem:[#allocation7 + $0x1b8] sm:$0xff] }
 0x34a   :  { %947 = vmatmul.mubr.f32.vlgmr.msra.gmra.mxu0 %v880_v3  ;;  %1018 = vmatmul.mubr.f32.vlgmr.msra.gmra.mxu1 %v880_v3  ;;  %v2926_v3 = vld [vmem:[#allocation7 + $0x1a0] sm:$0xff] }
 0x34b   :  { %1071 = vmatpush1.msra.mxu0 %v2379_v4  ;;  %1142 = vmatpush1.msra.mxu1 %v2421_v25  ;;  %v3447_v4 = vld [vmem:[#allocation17_spill] sm:$0xff]  ;;  %v3459_v25 = vld [vmem:[#allocation23_spill] sm:$0xff] }
 0x34c   :  { %1072 = vmatprep.subr.mxu0 %v2381_v6  ;;  %1143 = vmatprep.subr.mxu1 %v2427_v27  ;;  %v3448_v6 = vld [vmem:[#allocation27_spill] sm:$0xff]  ;;  %v3461_v27 = vld [vmem:[#allocation24_spill] sm:$0xff] }
 0x34d   :  { %1073 = vmatpush1.msra.mxu0 %v2384_v8  ;;  %1144 = vmatpush1.msra.mxu1 %v2433_v29  ;;  %v3449_v8 = vld [vmem:[#allocation18_spill] sm:$0xff]  ;;  %v3463_v29 = vld [vmem:[#allocation25_spill] sm:$0xff] }
 0x34e   :  { %1074 = vmatprep.subr.mxu0 %v2387_v10  ;;  %1145 = vmatprep.subr.mxu1 %v2439_v31  ;;  %v3450_v10 = vld [vmem:[#allocation28_spill] sm:$0xff]  ;;  %v3465_v31 = vld [vmem:[#allocation26_spill] sm:$0xff] }
 0x34f   :  { %1075 = vmatpush1.msra.mxu0 %v2389_v11  ;;  %1146 = vmatpush1.msra.mxu1 %v2445_v33  ;;  %v3451_v11 = vld [vmem:[#allocation19_spill] sm:$0xff]  ;;  %v3467_v33 = vld [vmem:[#allocation36_spill] sm:$0xff] }
 0x350   :  { %1076 = vmatprep.subr.mxu0 %v2392_v12  ;;  %1147 = vmatprep.subr.mxu1 %v2451_v35  ;;  %v3452_v12 = vld [vmem:[#allocation29_spill] sm:$0xff] }
 0x351   :  { %1077 = vmatpush1.msra.mxu0 %v2396_v14  ;;  %1148 = vmatpush1.msra.mxu1 %v2457_v37  ;;  %v3453_v14 = vld [vmem:[#allocation20_spill] sm:$0xff]  ;;  %v2891_v35 = vld [vmem:[#allocation7 + $0x1f8] sm:$0xff] }
 0x352   :  { %1078 = vmatprep.subr.mxu0 %v2402_v17  ;;  %1149 = vmatprep.subr.mxu1 %v2463_v39  ;;  %v3454_v17 = vld [vmem:[#allocation30_spill] sm:$0xff]  ;;  %3469 = vst [vmem:[#allocation16_spill] sm:$0xff] %v2891_v35 }
 0x353   :  { %1079 = vmatpush1.msra.mxu0 %v2405_v19  ;;  %1150 = vmatpush1.msra.mxu1 %v2469_v41  ;;  %v3455_v19 = vld [vmem:[#allocation21_spill] sm:$0xff] }
 0x354   :  { %1080 = vmatprep.subr.mxu0 %v2408_v21  ;;  %1151 = vmatprep.subr.mxu1 %v2475_v43  ;;  %v3456_v21 = vld [vmem:[#allocation31_spill] sm:$0xff] }
 0x355   :  { %1081 = vmatpush1.msra.mxu0 %v2413_v22  ;;  %1152 = vmatpush1.msra.mxu1 %v2481_v45  ;;  %v3457_v22 = vld [vmem:[#allocation22_spill] sm:$0xff] }
 0x356   :  { %1082 = vmatprep.subr.mxu0 %v2419_v24  ;;  %1153 = vmatprep.subr.mxu1 %v2487_v47  ;;  %v3458_v24 = vld [vmem:[#allocation32_spill] sm:$0xff] }
 0x357   :  { %1083 = vmatpush1.msra.mxu0 %v2425_v26  ;;  %1154 = vmatpush1.msra.mxu1 %v2493_v49  ;;  %v3460_v26 = vld [vmem:[#allocation33_spill] sm:$0xff] }
 0x358   :  { %1084 = vmatprep.subr.mxu0 %v2431_v28  ;;  %1155 = vmatprep.subr.mxu1 %v2499_v51  ;;  %v3462_v28 = vld [vmem:[#allocation34_spill] sm:$0xff] }
 0x359   :  { %1085 = vmatpush1.msra.mxu0 %v2437_v30  ;;  %1156 = vmatpush1.msra.mxu1 %v2505_v53  ;;  %v3464_v30 = vld [vmem:[#allocation35_spill] sm:$0xff] }
 0x35a   :  { %1086 = vmatprep.subr.mxu0 %v2443_v32  ;;  %1157 = vmatprep.subr.mxu1 %v2511_v55  ;;  %v3466_v32 = vmov 0.0  }
 0x35b   :  { %1087 = vmatpush1.msra.mxu0 %v2449_v34  ;;  %1158 = vmatpush1.msra.mxu1 %v2517_v57  ;;  %v2888_v34 = vld [vmem:[#allocation7 + $0x1e8] sm:$0xff] }
 0x35c   :  { %1088 = vmatprep.subr.mxu0 %v2455_v36  ;;  %1159 = vmatprep.subr.mxu1 %v2523_v59  ;;  %3468 = vst [vmem:[#allocation15_spill] sm:$0xff] %v2888_v34 }
 0x35d   :  { %1089 = vmatpush1.msra.mxu0 %v2461_v38  ;;  %1160 = vmatpush1.msra.mxu1 %v2529_v61 }
 0x35e   :  { %1090 = vmatprep.subr.mxu0 %v2467_v40  ;;  %1161 = vmatprep.subr.mxu1 %v2535_v63 }
 0x35f   :  { %1091 = vmatpush1.msra.mxu0 %v2473_v42  ;;  %1162 = vmatpush1.msra.mxu1 %v2539_v1 }
 0x360   :  { %1092 = vmatprep.subr.mxu0 %v3447_v4  ;;  %1163 = vmatprep.subr.mxu1 %v3448_v6  ;;  %v2929_v4 = vld [vmem:[#allocation7 + $0x1b0] sm:$0xff]  ;;  %v2932_v6 = vld [vmem:[#allocation7 + $0x188] sm:$0xff] }
 0x361   :  { %1093 = vmatpush1.msra.mxu0 %v3449_v8  ;;  %1164 = vmatpush1.msra.mxu1 %v3450_v10  ;;  %v2935_v8 = vld [vmem:[#allocation7 + $0x198] sm:$0xff]  ;;  %v2938_v10 = vld [vmem:[#allocation7 + $0x180] sm:$0xff] }
 0x362   :  { %1094 = vmatprep.subr.mxu0 %v3451_v11  ;;  %1165 = vmatprep.subr.mxu1 %v3452_v12  ;;  %v2941_v11 = vld [vmem:[#allocation7 + $0x190] sm:$0xff]  ;;  %v2944_v12 = vld [vmem:[#allocation7 + $0x168] sm:$0xff] }
 0x363   :  { %1095 = vmatpush1.msra.mxu0 %v3453_v14  ;;  %1166 = vmatpush1.msra.mxu1 %v3454_v17  ;;  %v2947_v14 = vld [vmem:[#allocation7 + $0x178] sm:$0xff]  ;;  %v2950_v17 = vld [vmem:[#allocation7 + $0x160] sm:$0xff] }
 0x364   :  { %1096 = vmatprep.subr.mxu0 %v3455_v19  ;;  %1167 = vmatprep.subr.mxu1 %v3456_v21  ;;  %v2953_v19 = vld [vmem:[#allocation7 + $0x170] sm:$0xff]  ;;  %v2956_v21 = vld [vmem:[#allocation7 + $0x148] sm:$0xff] }
 0x365   :  { %1097 = vmatpush1.msra.mxu0 %v3457_v22  ;;  %1168 = vmatpush1.msra.mxu1 %v3458_v24  ;;  %v2959_v22 = vld [vmem:[#allocation7 + $0x158] sm:$0xff]  ;;  %v2962_v24 = vld [vmem:[#allocation7 + $0x140] sm:$0xff] }
 0x366   :  { %1098 = vmatprep.subr.mxu0 %v3459_v25  ;;  %1169 = vmatprep.subr.mxu1 %v3460_v26  ;;  %v2965_v25 = vld [vmem:[#allocation7 + $0x150] sm:$0xff]  ;;  %v2968_v26 = vld [vmem:[#allocation7 + $0x128] sm:$0xff] }
 0x367   :  { %1099 = vmatpush1.msra.mxu0 %v3461_v27  ;;  %1170 = vmatpush1.msra.mxu1 %v3462_v28  ;;  %v2971_v27 = vld [vmem:[#allocation7 + $0x138] sm:$0xff]  ;;  %v2974_v28 = vld [vmem:[#allocation7 + $0x120] sm:$0xff] }
 0x368   :  { %1100 = vmatprep.subr.mxu0 %v3463_v29  ;;  %1171 = vmatprep.subr.mxu1 %v3464_v30  ;;  %v2977_v29 = vld [vmem:[#allocation7 + $0x130] sm:$0xff]  ;;  %v2980_v30 = vld [vmem:[#allocation7 + $0x108] sm:$0xff] }
 0x369   :  { %1101 = vmatpush1.msra.mxu0 %v3465_v31  ;;  %1134 = vmatprep.mubr.f32.mxu0 %v3466_v32  ;;  %v2983_v31 = vld [vmem:[#allocation7 + $0x118] sm:$0xff] }
 0x36a   :  { %1172 = vmatpush1.msra.mxu1 %v3467_v33  ;;  %1205 = vmatprep.mubr.f32.mxu1 %v3466_v32  ;;  %v2986_v33 = vld [vmem:[#allocation7 + $0x100] sm:$0xff] }
 0x36b   :  { %1243 = vmatprep.subr.mxu0 %v2888_v34  ;;  %1314 = vmatprep.subr.mxu1 %v2891_v35 }
 0x40a   :  { %v948_v36 = vpop.f32.mrf.mxu0  ;;  %v1019_v40 = vpop.f32.mrf.mxu1 }
 0x40b   :  { %v1028_v37 = vrot.slane %v948_v36, 2  ;;  %v1030_v53 = vrot.slane %v1019_v40, 2  ;;  %v2989_v36 = vld [vmem:[#allocation7 + $0x110] sm:$0xff] }
 0x40c   :  { %v950_v38 = vpop.f32.mrf.mxu0  ;;  %v1021_v47 = vpop.f32.mrf.mxu1  ;;  %v3001_v40 = vld [vmem:[#allocation7 + $0xf0] sm:$0xff] }
 0x40d   :  { %v1036_v39 = vadd.f32 %v1028_v37, %v2657_v50  ;;  %v1029_v41 = vrot.slane %v950_v38, 2  ;;  %v1031_v49 = vrot.slane %v1021_v47, 2  ;;  %v1038_v59 = vadd.f32 %v1030_v53, %v2670_v7  ;;  %v2992_v37 = vld [vmem:[#allocation7 + $0xe8] sm:$0xff]  ;;  %v2995_v38 = vld [vmem:[#allocation7 + $0xf8] sm:$0xff]  ;;  %v3025_v53 = vld [vmem:[#allocation7 + $0xb0] sm:$0xff] }
 0x40e   :  { %v3016_v47 = vld [vmem:[#allocation7 + $0xa8] sm:$0xff] }
 0x40f   :  { %v1931_v42 = vmul.f32 -1.442695, %v1036_v39  ;;  %v1037_v43 = vadd.f32 %v1029_v41, %v2659_v48  ;;  %v1039_v51 = vadd.f32 %v1031_v49, %v2667_v60  ;;  %v2998_v39 = vld [vmem:[#allocation7 + $0xe0] sm:$0xff]  ;;  %v3004_v41 = vld [vmem:[#allocation7 + $0xc8] sm:$0xff]  ;;  %v3019_v49 = vld [vmem:[#allocation7 + $0xb8] sm:$0xff] }
 0x411   :  { %2058 = vpow2.f32 %v1931_v42  ;;  %v1932_v45 = vmul.f32 -1.442695, %v1037_v43  ;;  %v1933_v55 = vmul.f32 -1.442695, %v1039_v51  ;;  %v3007_v42 = vld [vmem:[#allocation7 + $0xd8] sm:$0xff]  ;;  %v3010_v43 = vld [vmem:[#allocation7 + $0xc0] sm:$0xff] }
 0x412   :  { %v3022_v51 = vld [vmem:[#allocation7 + $0xa0] sm:$0xff] }
 0x413   :  { %2060 = vpow2.f32 %v1932_v45  ;;  %v3013_v45 = vld [vmem:[#allocation7 + $0xd0] sm:$0xff] }
 0x414   :  { %2062 = vpow2.f32 %v1933_v55  ;;  %v3028_v55 = vld [vmem:[#allocation7 + $0x88] sm:$0xff] }
 0x415   :  { %3470 = vst [vmem:[#allocation17_spill] sm:$0xff] %v3028_v55 }
 0x41e   :  { %v2059_v57 = vpop.eup %2058 }
 0x41f   :  { %v1043_v61 = vadd.f32 1.0, %v2059_v57  ;;  %v3031_v57 = vld [vmem:[#allocation7 + $0x98] sm:$0xff] }
 0x420   :  { %v2061_v63 = vpop.eup %2060  ;;  %3471 = vst [vmem:[#allocation27_spill] sm:$0xff] %v3031_v57 }
 0x421   :  { %2064 = vrcp.f32 %v1043_v61  ;;  %v1049_v50 = vadd.f32 1.0, %v2061_v63  ;;  %v2063_v48 = vpop.eup %2062  ;;  %v3037_v61 = vld [vmem:[#allocation7 + $0x90] sm:$0xff]  ;;  %v3040_v63 = vld [vmem:[#allocation7 + $0x68] sm:$0xff] }
 0x422   :  { %2066 = vtanh.f32 %v1038_v59  ;;  %v1056_v0 = vadd.f32 1.0, %v2063_v48  ;;  %v3034_v59 = vld [vmem:[#allocation7 + $0x80] sm:$0xff]  ;;  %3473 = vst [vmem:[#allocation28_spill] sm:$0xff] %v3037_v61  ;;  %3474 = vst [vmem:[#allocation19_spill] sm:$0xff] %v3040_v63 }
 0x423   :  { %2068 = vrcp.f32 %v1049_v50  ;;  %3472 = vst [vmem:[#allocation18_spill] sm:$0xff] %v3034_v59  ;;  %v3043_v50 = vld [vmem:[#allocation7 + $0x78] sm:$0xff]  ;;  %v3046_v48 = vld [vmem:[#allocation7 + $0x60] sm:$0xff] }
 0x424   :  { %2070 = vrcp.f32 %v1056_v0  ;;  %3475 = vst [vmem:[#allocation29_spill] sm:$0xff] %v3043_v50  ;;  %3476 = vst [vmem:[#allocation20_spill] sm:$0xff] %v3046_v48  ;;  %v3061_v0 = vld [vmem:[#allocation7 + $0x50] sm:$0xff] }
 0x425   :  { %3481 = vst [vmem:[#allocation32_spill] sm:$0xff] %v3061_v0 }
 0x42e   :  { %v2065_v1 = vpop.eup %2064 }
 0x42f   :  { %v2067_v54 = vpop.eup %2066 }
 0x430   :  { %v2069_v13 = vpop.eup %2068  ;;  %v1063_v60 = vmul.f32 %v2067_v54, %v2065_v1  ;;  %v3049_v1 = vld [vmem:[#allocation7 + $0x70] sm:$0xff]  ;;  %v3052_v54 = vld [vmem:[#allocation7 + $0x48] sm:$0xff] }
 0x431   :  { %v1062_v52 = vmul.f32 %v2069_v13, %v1060_v5  ;;  %v2071_v7 = vpop.eup %2070  ;;  %3477 = vst [vmem:[#allocation30_spill] sm:$0xff] %v3049_v1  ;;  %3478 = vst [vmem:[#allocation21_spill] sm:$0xff] %v3052_v54  ;;  %v3055_v5 = vld [vmem:[#allocation7 + $0x58] sm:$0xff]  ;;  %v3058_v13 = vld [vmem:[#allocation7 + $0x40] sm:$0xff] }
 0x432   :  { %3479 = vst [vmem:[#allocation31_spill] sm:$0xff] %v3055_v5  ;;  %3480 = vst [vmem:[#allocation22_spill] sm:$0xff] %v3058_v13 }
 0x433   :  { %v2899_v56 = vadd.f32 %v1063_v60, %v1062_v52  ;;  %v3064_v60 = vld [vmem:[#allocation7 + $0x28] sm:$0xff]  ;;  %v3067_v52 = vld [vmem:[#allocation7 + $0x38] sm:$0xff] }
 0x434   :  { %3482 = vst [vmem:[#allocation23_spill] sm:$0xff] %v3064_v60  ;;  %3483 = vst [vmem:[#allocation33_spill] sm:$0xff] %v3067_v52 }
 0x435   :  { %2072 = vtanh.f32 %v2899_v56 }
 0x442   :  { %v2073_v44 = vpop.eup %2072 }
 0x443   :  { %v1066_v9 = vmul.f32 %v2073_v44, %v2071_v7  ;;  %v3070_v7 = vld [vmem:[#allocation7 + $0x20] sm:$0xff]  ;;  %v3073_v44 = vld [vmem:[#allocation7 + $0x30] sm:$0xff] }
 0x444   :  { %3484 = vst [vmem:[#allocation24_spill] sm:$0xff] %v3070_v7  ;;  %3485 = vst [vmem:[#allocation34_spill] sm:$0xff] %v3073_v44 }
 0x445   :  { %v1068_v20 = vrot.slane %v1066_v9, 6  ;;  %v3076_v9 = vld [vmem:[#allocation7 + $0x8] sm:$0xff] }
 0x446   :  { %3486 = vst [vmem:[#allocation25_spill] sm:$0xff] %v3076_v9 }
 0x447   :  { %1135 = vmatmul.mubr.f32.vlgmr.msra.gmra.mxu0 %v1068_v20  ;;  %1206 = vmatmul.mubr.f32.vlgmr.msra.gmra.mxu1 %v1068_v20  ;;  %v3079_v20 = vld [vmem:[#allocation7 + $0x18] sm:$0xff] }
 0x448   :  { %1244 = vmatpush1.msra.mxu0 %v2902_v16  ;;  %1315 = vmatpush1.msra.mxu1 %v2905_v58  ;;  %3487 = vst [vmem:[#allocation35_spill] sm:$0xff] %v3079_v20 }
 0x449   :  { %1245 = vmatprep.subr.mxu0 %v2908_v15  ;;  %1316 = vmatprep.subr.mxu1 %v2911_v46 }
 0x44a   :  { %1246 = vmatpush1.msra.mxu0 %v2914_v62  ;;  %1317 = vmatpush1.msra.mxu1 %v2917_v2 }
 0x44b   :  { %1247 = vmatprep.subr.mxu0 %v2920_v23  ;;  %1318 = vmatprep.subr.mxu1 %v2923_v18 }
 0x44c   :  { %1248 = vmatpush1.msra.mxu0 %v2926_v3  ;;  %1319 = vmatpush1.msra.mxu1 %v2929_v4 }
 0x44d   :  { %1249 = vmatprep.subr.mxu0 %v2932_v6  ;;  %1320 = vmatprep.subr.mxu1 %v2935_v8 }
 0x44e   :  { %1250 = vmatpush1.msra.mxu0 %v2938_v10  ;;  %1321 = vmatpush1.msra.mxu1 %v2941_v11 }
 0x44f   :  { %1251 = vmatprep.subr.mxu0 %v2944_v12  ;;  %1322 = vmatprep.subr.mxu1 %v2947_v14 }
 0x450   :  { %1252 = vmatpush1.msra.mxu0 %v2950_v17  ;;  %1323 = vmatpush1.msra.mxu1 %v2953_v19 }
 0x451   :  { %1253 = vmatprep.subr.mxu0 %v2956_v21  ;;  %1324 = vmatprep.subr.mxu1 %v2959_v22 }
 0x452   :  { %1254 = vmatpush1.msra.mxu0 %v2962_v24  ;;  %1325 = vmatpush1.msra.mxu1 %v2965_v25 }
 0x453   :  { %1255 = vmatprep.subr.mxu0 %v2968_v26  ;;  %1326 = vmatprep.subr.mxu1 %v2971_v27 }
 0x454   :  { %1256 = vmatpush1.msra.mxu0 %v2974_v28  ;;  %1327 = vmatpush1.msra.mxu1 %v2977_v29 }
 0x455   :  { %1257 = vmatprep.subr.mxu0 %v2980_v30  ;;  %1328 = vmatprep.subr.mxu1 %v2983_v31 }
 0x456   :  { %1258 = vmatpush1.msra.mxu0 %v2986_v33  ;;  %1329 = vmatpush1.msra.mxu1 %v2989_v36 }
 0x457   :  { %1259 = vmatprep.subr.mxu0 %v2992_v37  ;;  %1330 = vmatprep.subr.mxu1 %v2995_v38 }
 0x458   :  { %1260 = vmatpush1.msra.mxu0 %v2998_v39  ;;  %1331 = vmatpush1.msra.mxu1 %v3001_v40 }
 0x459   :  { %1261 = vmatprep.subr.mxu0 %v3004_v41  ;;  %1332 = vmatprep.subr.mxu1 %v3007_v42 }
 0x45a   :  { %1262 = vmatpush1.msra.mxu0 %v3010_v43  ;;  %1333 = vmatpush1.msra.mxu1 %v3013_v45 }
 0x45b   :  { %1263 = vmatprep.subr.mxu0 %v3016_v47  ;;  %1334 = vmatprep.subr.mxu1 %v3019_v49 }
 0x45c   :  { %1264 = vmatpush1.msra.mxu0 %v3022_v51  ;;  %1335 = vmatpush1.msra.mxu1 %v3025_v53 }
 0x45d   :  { %1265 = vmatprep.subr.mxu0 %v3028_v55  ;;  %1336 = vmatprep.subr.mxu1 %v3031_v57 }
 0x45e   :  { %1266 = vmatpush1.msra.mxu0 %v3034_v59  ;;  %1337 = vmatpush1.msra.mxu1 %v3037_v61 }
 0x45f   :  { %1267 = vmatprep.subr.mxu0 %v3040_v63  ;;  %1338 = vmatprep.subr.mxu1 %v3043_v50  ;;  %v3493_v63 = vld [vmem:[#allocation39_spill] sm:$0xff] }
 0x460   :  { %1268 = vmatpush1.msra.mxu0 %v3046_v48  ;;  %1339 = vmatpush1.msra.mxu1 %v3049_v1  ;;  %v3492_v48 = vld [vmem:[#allocation40_spill] sm:$0xff] }
 0x461   :  { %1269 = vmatprep.subr.mxu0 %v3052_v54  ;;  %1340 = vmatprep.subr.mxu1 %v3055_v5 }
 0x462   :  { %1270 = vmatpush1.msra.mxu0 %v3058_v13  ;;  %1341 = vmatpush1.msra.mxu1 %v3061_v0  ;;  %v3491_v13 = vld [vmem:[#allocation38_spill] sm:$0xff] }
 0x463   :  { %1271 = vmatprep.subr.mxu0 %v3064_v60  ;;  %1342 = vmatprep.subr.mxu1 %v3067_v52  ;;  %v3082_v60 = vld [vmem:[#allocation7] sm:$0xff]  ;;  %v3086_v52 = vld [vmem:[#allocation7 + $0x10] sm:$0xff] }
 0x464   :  { %1272 = vmatpush1.msra.mxu0 %v3070_v7  ;;  %1343 = vmatpush1.msra.mxu1 %v3073_v44  ;;  %3488 = vst [vmem:[#allocation26_spill] sm:$0xff] %v3082_v60  ;;  %3489 = vst [vmem:[#allocation36_spill] sm:$0xff] %v3086_v52  ;;  %v3490_v44 = vld [vmem:[#allocation37_spill] sm:$0xff] }
 0x465   :  { %1273 = vmatprep.subr.mxu0 %v3076_v9  ;;  %1344 = vmatprep.subr.mxu1 %v3079_v20 }
 0x466   :  { %1274 = vmatpush1.msra.mxu0 %v3082_v60  ;;  %1307 = vmatprep.mubr.f32.mxu0 %v3466_v32 }
 0x467   :  { %1345 = vmatpush1.msra.mxu1 %v3086_v52  ;;  %1378 = vmatprep.mubr.f32.mxu1 %v3466_v32 }
 0x468   :  { %1431 = vmatprep.subr.mxu0 %v2888_v34  ;;  %1502 = vmatprep.subr.mxu1 %v2891_v35 }
 0x507   :  { %v1136_v9 = vpop.f32.mrf.mxu0  ;;  %v1207_v60 = vpop.f32.mrf.mxu1 }
 0x508   :  { %v1212_v7 = vadd.f32 %v1136_v9, %v3490_v44  ;;  %v1214_v34 = vadd.f32 %v1207_v60, %v3493_v63  ;;  %v3498_v60 = vld [vmem:[#allocation30_spill] sm:$0xff] }
 0x509   :  { %v1138_v20 = vpop.f32.mrf.mxu0  ;;  %v1209_v1 = vpop.f32.mrf.mxu1 }
 0x50a   :  { %v1934_v0 = vmul.f32 -1.442695, %v1212_v7  ;;  %v1213_v5 = vadd.f32 %v1138_v20, %v3491_v13  ;;  %v1215_v52 = vadd.f32 %v1209_v1, %v3492_v48 }
 0x50c   :  { %2074 = vpow2.f32 %v1934_v0  ;;  %v1935_v54 = vmul.f32 -1.442695, %v1213_v5  ;;  %v1936_v50 = vmul.f32 -1.442695, %v1215_v52  ;;  %v1236_v5 = vrot.slane %v2899_v56, 6  ;;  %v3496_v56 = vld [vmem:[#allocation29_spill] sm:$0xff] }
 0x50e   :  { %2076 = vpow2.f32 %v1935_v54 }
 0x50f   :  { %2078 = vpow2.f32 %v1936_v50 }
 0x519   :  { %v2075_v32 = vpop.eup %2074 }
 0x51a   :  { %v1219_v61 = vadd.f32 1.0, %v2075_v32 }
 0x51b   :  { %v2077_v35 = vpop.eup %2076 }
 0x51c   :  { %2080 = vrcp.f32 %v1219_v61  ;;  %v1225_v9 = vadd.f32 1.0, %v2077_v35  ;;  %v2079_v7 = vpop.eup %2078  ;;  %v3495_v35 = vld [vmem:[#allocation19_spill] sm:$0xff] }
 0x51d   :  { %2082 = vtanh.f32 %v1214_v34  ;;  %v1232_v13 = vadd.f32 1.0, %v2079_v7  ;;  %v3494_v34 = vld [vmem:[#allocation28_spill] sm:$0xff]  ;;  %v3501_v7 = vld [vmem:[#allocation22_spill] sm:$0xff] }
 0x51e   :  { %2084 = vrcp.f32 %v1225_v9  ;;  %v3500_v9 = vld [vmem:[#allocation31_spill] sm:$0xff] }
 0x51f   :  { %2086 = vrcp.f32 %v1232_v13  ;;  %v3497_v13 = vld [vmem:[#allocation20_spill] sm:$0xff] }
 0x529   :  { %v2081_v20 = vpop.eup %2080 }
 0x52a   :  { %v2083_v0 = vpop.eup %2082 }
 0x52b   :  { %v2085_v54 = vpop.eup %2084  ;;  %v1239_v44 = vmul.f32 %v2083_v0, %v2081_v20  ;;  %v3502_v20 = vld [vmem:[#allocation32_spill] sm:$0xff]  ;;  %v3503_v0 = vld [vmem:[#allocation23_spill] sm:$0xff] }
 0x52c   :  { %v1238_v1 = vmul.f32 %v2085_v54, %v1236_v5  ;;  %v2087_v32 = vpop.eup %2086  ;;  %v3504_v5 = vld [vmem:[#allocation33_spill] sm:$0xff]  ;;  %v3505_v54 = vld [vmem:[#allocation24_spill] sm:$0xff] }
 0x52e   :  { %v3097_v52 = vadd.f32 %v1239_v44, %v1238_v1  ;;  %v3499_v44 = vld [vmem:[#allocation21_spill] sm:$0xff]  ;;  %v3506_v1 = vld [vmem:[#allocation34_spill] sm:$0xff] }
 0x530   :  { %2088 = vtanh.f32 %v3097_v52 }
 0x53d   :  { %v2089_v50 = vpop.eup %2088 }
 0x53e   :  { %v1242_v61 = vmul.f32 %v2089_v50, %v2087_v32  ;;  %v3507_v32 = vld [vmem:[#allocation25_spill] sm:$0xff]  ;;  %v3508_v50 = vld [vmem:[#allocation35_spill] sm:$0xff] }
 0x540   :  { %1308 = vmatmul.mubr.f32.vlgmr.msra.gmra.mxu0 %v1242_v61  ;;  %1379 = vmatmul.mubr.f32.vlgmr.msra.gmra.mxu1 %v1242_v61  ;;  %v3509_v61 = vld [vmem:[#allocation26_spill] sm:$0xff] }
 0x541   :  { %1432 = vmatpush1.msra.mxu0 %v2902_v16  ;;  %1503 = vmatpush1.msra.mxu1 %v2905_v58 }
 0x542   :  { %1433 = vmatprep.subr.mxu0 %v2908_v15  ;;  %1504 = vmatprep.subr.mxu1 %v2911_v46 }
 0x543   :  { %1434 = vmatpush1.msra.mxu0 %v2914_v62  ;;  %1505 = vmatpush1.msra.mxu1 %v2917_v2 }
 0x544   :  { %1435 = vmatprep.subr.mxu0 %v2920_v23  ;;  %1506 = vmatprep.subr.mxu1 %v2923_v18 }
 0x545   :  { %1436 = vmatpush1.msra.mxu0 %v2926_v3  ;;  %1507 = vmatpush1.msra.mxu1 %v2929_v4 }
 0x546   :  { %1437 = vmatprep.subr.mxu0 %v2932_v6  ;;  %1508 = vmatprep.subr.mxu1 %v2935_v8 }
 0x547   :  { %1438 = vmatpush1.msra.mxu0 %v2938_v10  ;;  %1509 = vmatpush1.msra.mxu1 %v2941_v11 }
 0x548   :  { %1439 = vmatprep.subr.mxu0 %v2944_v12  ;;  %1510 = vmatprep.subr.mxu1 %v2947_v14 }
 0x549   :  { %1440 = vmatpush1.msra.mxu0 %v2950_v17  ;;  %1511 = vmatpush1.msra.mxu1 %v2953_v19 }
 0x54a   :  { %1441 = vmatprep.subr.mxu0 %v2956_v21  ;;  %1512 = vmatprep.subr.mxu1 %v2959_v22 }
 0x54b   :  { %1442 = vmatpush1.msra.mxu0 %v2962_v24  ;;  %1513 = vmatpush1.msra.mxu1 %v2965_v25 }
 0x54c   :  { %1443 = vmatprep.subr.mxu0 %v2968_v26  ;;  %1514 = vmatprep.subr.mxu1 %v2971_v27 }
 0x54d   :  { %1444 = vmatpush1.msra.mxu0 %v2974_v28  ;;  %1515 = vmatpush1.msra.mxu1 %v2977_v29 }
 0x54e   :  { %1445 = vmatprep.subr.mxu0 %v2980_v30  ;;  %1516 = vmatprep.subr.mxu1 %v2983_v31 }
 0x54f   :  { %1446 = vmatpush1.msra.mxu0 %v2986_v33  ;;  %1517 = vmatpush1.msra.mxu1 %v2989_v36 }
 0x550   :  { %1447 = vmatprep.subr.mxu0 %v2992_v37  ;;  %1518 = vmatprep.subr.mxu1 %v2995_v38 }
 0x551   :  { %1448 = vmatpush1.msra.mxu0 %v2998_v39  ;;  %1519 = vmatpush1.msra.mxu1 %v3001_v40 }
 0x552   :  { %1449 = vmatprep.subr.mxu0 %v3004_v41  ;;  %1520 = vmatprep.subr.mxu1 %v3007_v42 }
 0x553   :  { %1450 = vmatpush1.msra.mxu0 %v3010_v43  ;;  %1521 = vmatpush1.msra.mxu1 %v3013_v45 }
 0x554   :  { %1451 = vmatprep.subr.mxu0 %v3016_v47  ;;  %1522 = vmatprep.subr.mxu1 %v3019_v49 }
 0x555   :  { %1452 = vmatpush1.msra.mxu0 %v3022_v51  ;;  %1523 = vmatpush1.msra.mxu1 %v3025_v53 }
 0x556   :  { %1453 = vmatprep.subr.mxu0 %v3028_v55  ;;  %1524 = vmatprep.subr.mxu1 %v3031_v57 }
 0x557   :  { %1454 = vmatpush1.msra.mxu0 %v3034_v59  ;;  %1525 = vmatpush1.msra.mxu1 %v3494_v34 }
 0x558   :  { %1455 = vmatprep.subr.mxu0 %v3495_v35  ;;  %1526 = vmatprep.subr.mxu1 %v3496_v56  ;;  %v3515_v56 = vld [vmem:[#allocation38_spill] sm:$0xff] }
 0x559   :  { %1456 = vmatpush1.msra.mxu0 %v3497_v13  ;;  %1527 = vmatpush1.msra.mxu1 %v3498_v60 }
 0x55a   :  { %1457 = vmatprep.subr.mxu0 %v3499_v44  ;;  %1528 = vmatprep.subr.mxu1 %v3500_v9  ;;  %v3510_v44 = vmov 0.0   ;;  %v3511_v9 = vld [vmem:[#allocation36_spill] sm:$0xff] }
 0x55b   :  { %1458 = vmatpush1.msra.mxu0 %v3501_v7  ;;  %1529 = vmatpush1.msra.mxu1 %v3502_v20  ;;  %v3512_v20 = vld [vmem:[#allocation15_spill] sm:$0xff] }
 0x55c   :  { %1459 = vmatprep.subr.mxu0 %v3503_v0  ;;  %1530 = vmatprep.subr.mxu1 %v3504_v5  ;;  %v3513_v0 = vld [vmem:[#allocation16_spill] sm:$0xff] }
 0x55d   :  { %1460 = vmatpush1.msra.mxu0 %v3505_v54  ;;  %1531 = vmatpush1.msra.mxu1 %v3506_v1  ;;  %v3514_v1 = vld [vmem:[#allocation37_spill] sm:$0xff] }
 0x55e   :  { %1461 = vmatprep.subr.mxu0 %v3507_v32  ;;  %1532 = vmatprep.subr.mxu1 %v3508_v50 }
 0x55f   :  { %1462 = vmatpush1.msra.mxu0 %v3509_v61  ;;  %1495 = vmatprep.mubr.f32.mxu0 %v3510_v44 }
 0x560   :  { %1533 = vmatpush1.msra.mxu1 %v3511_v9  ;;  %1566 = vmatprep.mubr.f32.mxu1 %v3510_v44 }
 0x561   :  { %1619 = vmatprep.subr.mxu0 %v3512_v20  ;;  %1690 = vmatprep.subr.mxu1 %v3513_v0 }
 0x600   :  { %v1309_v5 = vpop.f32.mrf.mxu0  ;;  %v1380_v32 = vpop.f32.mrf.mxu1 }
 0x601   :  { %v1389_v54 = vrot.slane %v1309_v5, 6  ;;  %v1391_v20 = vrot.slane %v1380_v32, 6 }
 0x602   :  { %v1311_v7 = vpop.f32.mrf.mxu0  ;;  %v1382_v34 = vpop.f32.mrf.mxu1 }
 0x603   :  { %v1397_v60 = vadd.f32 %v1389_v54, %v3514_v1  ;;  %v1390_v13 = vrot.slane %v1311_v7, 6  ;;  %v1392_v9 = vrot.slane %v1382_v34, 6  ;;  %v1399_v5 = vadd.f32 %v1391_v20, %v3493_v63 }
 0x605   :  { %v1937_v50 = vmul.f32 -1.442695, %v1397_v60  ;;  %v1398_v61 = vadd.f32 %v1390_v13, %v3515_v56  ;;  %v1400_v44 = vadd.f32 %v1392_v9, %v3492_v48 }
 0x607   :  { %2090 = vpow2.f32 %v1937_v50  ;;  %v1938_v35 = vmul.f32 -1.442695, %v1398_v61  ;;  %v1939_v59 = vmul.f32 -1.442695, %v1400_v44 }
 0x609   :  { %2092 = vpow2.f32 %v1938_v35  ;;  %v1421_v35 = vrot.slane %v3097_v52, 6 }
 0x60a   :  { %2094 = vpow2.f32 %v1939_v59 }
 0x614   :  { %v2091_v0 = vpop.eup %2090 }
 0x615   :  { %v1404_v57 = vadd.f32 1.0, %v2091_v0 }
 0x616   :  { %v2093_v55 = vpop.eup %2092 }
 0x617   :  { %2096 = vrcp.f32 %v1404_v57  ;;  %v1410_v7 = vadd.f32 1.0, %v2093_v55  ;;  %v2095_v13 = vpop.eup %2094 }
 0x618   :  { %2098 = vtanh.f32 %v1399_v5  ;;  %v1417_v50 = vadd.f32 1.0, %v2095_v13 }
 0x619   :  { %2100 = vrcp.f32 %v1410_v7 }
 0x61a   :  { %2102 = vrcp.f32 %v1417_v50 }
 0x624   :  { %v2097_v60 = vpop.eup %2096 }
 0x625   :  { %v2099_v54 = vpop.eup %2098 }
 0x626   :  { %v2101_v34 = vpop.eup %2100  ;;  %v1424_v9 = vmul.f32 %v2099_v54, %v2097_v60 }
 0x627   :  { %v1423_v32 = vmul.f32 %v2101_v34, %v1421_v35  ;;  %v2103_v61 = vpop.eup %2102 }
 0x629   :  { %v3171_v44 = vadd.f32 %v1424_v9, %v1423_v32  ;;  %v1819_v9 = vld [vmem:[#allocation8 + $0x78] sm:$0xff]  ;;  %v1818_v32 = vld [vmem:[#allocation8 + $0x70] sm:$0xff] }
 0x62b   :  { %2104 = vtanh.f32 %v3171_v44  ;;  %v1609_v20 = vrot.slane %v3171_v44, 6  ;;  %v1817_v44 = vld [vmem:[#allocation8 + $0x68] sm:$0xff] }
 0x638   :  { %v2105_v59 = vpop.eup %2104 }
 0x639   :  { %v1427_v57 = vmul.f32 %v2105_v59, %v2103_v61  ;;  %v1816_v61 = vld [vmem:[#allocation8 + $0x60] sm:$0xff]  ;;  %v1815_v59 = vld [vmem:[#allocation8 + $0x58] sm:$0xff] }
 0x63b   :  { %v1429_v55 = vrot.slane %v1427_v57, 2  ;;  %v1814_v57 = vld [vmem:[#allocation8 + $0x50] sm:$0xff] }
 0x63d   :  { %1496 = vmatmul.mubr.f32.vlgmr.msra.gmra.mxu0 %v1429_v55  ;;  %1567 = vmatmul.mubr.f32.vlgmr.msra.gmra.mxu1 %v1429_v55  ;;  %v1813_v55 = vld [vmem:[#allocation8 + $0x48] sm:$0xff] }
 0x63e   :  { %1620 = vmatpush1.msra.mxu0 %v2902_v16  ;;  %1691 = vmatpush1.msra.mxu1 %v2905_v58  ;;  %v3516_v16 = vld [vmem:[#allocation17_spill] sm:$0xff]  ;;  %v3517_v58 = vld [vmem:[#allocation27_spill] sm:$0xff] }
 0x63f   :  { %1621 = vmatprep.subr.mxu0 %v2908_v15  ;;  %1692 = vmatprep.subr.mxu1 %v2911_v46  ;;  %v3518_v15 = vld [vmem:[#allocation18_spill] sm:$0xff]  ;;  %v3519_v46 = vld [vmem:[#allocation28_spill] sm:$0xff] }
 0x640   :  { %1622 = vmatpush1.msra.mxu0 %v2914_v62  ;;  %1693 = vmatpush1.msra.mxu1 %v2917_v2  ;;  %v3520_v62 = vld [vmem:[#allocation19_spill] sm:$0xff]  ;;  %v3521_v2 = vld [vmem:[#allocation29_spill] sm:$0xff] }
 0x641   :  { %1623 = vmatprep.subr.mxu0 %v2920_v23  ;;  %1694 = vmatprep.subr.mxu1 %v2923_v18  ;;  %v3522_v23 = vld [vmem:[#allocation20_spill] sm:$0xff]  ;;  %v3523_v18 = vld [vmem:[#allocation30_spill] sm:$0xff] }
 0x642   :  { %1624 = vmatpush1.msra.mxu0 %v2926_v3  ;;  %1695 = vmatpush1.msra.mxu1 %v2929_v4  ;;  %v3524_v3 = vld [vmem:[#allocation21_spill] sm:$0xff]  ;;  %v3525_v4 = vld [vmem:[#allocation31_spill] sm:$0xff] }
 0x643   :  { %1625 = vmatprep.subr.mxu0 %v2932_v6  ;;  %1696 = vmatprep.subr.mxu1 %v2935_v8  ;;  %v3526_v6 = vld [vmem:[#allocation22_spill] sm:$0xff]  ;;  %v3527_v8 = vld [vmem:[#allocation32_spill] sm:$0xff] }
 0x644   :  { %1626 = vmatpush1.msra.mxu0 %v2938_v10  ;;  %1697 = vmatpush1.msra.mxu1 %v2941_v11  ;;  %v3528_v10 = vld [vmem:[#allocation23_spill] sm:$0xff]  ;;  %v3529_v11 = vld [vmem:[#allocation33_spill] sm:$0xff] }
 0x645   :  { %1627 = vmatprep.subr.mxu0 %v2944_v12  ;;  %1698 = vmatprep.subr.mxu1 %v2947_v14  ;;  %v3530_v12 = vld [vmem:[#allocation24_spill] sm:$0xff]  ;;  %v3531_v14 = vld [vmem:[#allocation34_spill] sm:$0xff] }
 0x646   :  { %1628 = vmatpush1.msra.mxu0 %v2950_v17  ;;  %1699 = vmatpush1.msra.mxu1 %v2953_v19  ;;  %v3532_v17 = vld [vmem:[#allocation25_spill] sm:$0xff]  ;;  %v3533_v19 = vld [vmem:[#allocation35_spill] sm:$0xff] }
 0x647   :  { %1629 = vmatprep.subr.mxu0 %v2956_v21  ;;  %1700 = vmatprep.subr.mxu1 %v2959_v22  ;;  %v3534_v21 = vld [vmem:[#allocation26_spill] sm:$0xff]  ;;  %v3535_v22 = vmov 0.0  }
 0x648   :  { %1630 = vmatpush1.msra.mxu0 %v2962_v24  ;;  %1701 = vmatpush1.msra.mxu1 %v2965_v25  ;;  %v3536_v24 = vld [vmem:[#allocation36_spill] sm:$0xff] }
 0x649   :  { %1631 = vmatprep.subr.mxu0 %v2968_v26  ;;  %1702 = vmatprep.subr.mxu1 %v2971_v27 }
 0x64a   :  { %1632 = vmatpush1.msra.mxu0 %v2974_v28  ;;  %1703 = vmatpush1.msra.mxu1 %v2977_v29 }
 0x64b   :  { %1633 = vmatprep.subr.mxu0 %v2980_v30  ;;  %1704 = vmatprep.subr.mxu1 %v2983_v31 }
 0x64c   :  { %1634 = vmatpush1.msra.mxu0 %v2986_v33  ;;  %1705 = vmatpush1.msra.mxu1 %v2989_v36 }
 0x64d   :  { %1635 = vmatprep.subr.mxu0 %v2992_v37  ;;  %1706 = vmatprep.subr.mxu1 %v2995_v38 }
 0x64e   :  { %1636 = vmatpush1.msra.mxu0 %v2998_v39  ;;  %1707 = vmatpush1.msra.mxu1 %v3001_v40 }
 0x64f   :  { %1637 = vmatprep.subr.mxu0 %v3004_v41  ;;  %1708 = vmatprep.subr.mxu1 %v3007_v42 }
 0x650   :  { %1638 = vmatpush1.msra.mxu0 %v3010_v43  ;;  %1709 = vmatpush1.msra.mxu1 %v3013_v45 }
 0x651   :  { %1639 = vmatprep.subr.mxu0 %v3016_v47  ;;  %1710 = vmatprep.subr.mxu1 %v3019_v49 }
 0x652   :  { %1640 = vmatpush1.msra.mxu0 %v3022_v51  ;;  %1711 = vmatpush1.msra.mxu1 %v3025_v53 }
 0x653   :  { %1641 = vmatprep.subr.mxu0 %v3516_v16  ;;  %1712 = vmatprep.subr.mxu1 %v3517_v58  ;;  %v1812_v16 = vld [vmem:[#allocation8 + $0x40] sm:$0xff]  ;;  %v1811_v58 = vld [vmem:[#allocation8 + $0x38] sm:$0xff] }
 0x654   :  { %1642 = vmatpush1.msra.mxu0 %v3518_v15  ;;  %1713 = vmatpush1.msra.mxu1 %v3519_v46  ;;  %v1810_v15 = vld [vmem:[#allocation8 + $0x30] sm:$0xff]  ;;  %v1809_v46 = vld [vmem:[#allocation8 + $0x28] sm:$0xff] }
 0x655   :  { %1643 = vmatprep.subr.mxu0 %v3520_v62  ;;  %1714 = vmatprep.subr.mxu1 %v3521_v2  ;;  %v1808_v62 = vld [vmem:[#allocation8 + $0x20] sm:$0xff]  ;;  %v1807_v2 = vld [vmem:[#allocation8 + $0x18] sm:$0xff] }
 0x656   :  { %1644 = vmatpush1.msra.mxu0 %v3522_v23  ;;  %1715 = vmatpush1.msra.mxu1 %v3523_v18  ;;  %v1806_v23 = vld [vmem:[#allocation8 + $0x10] sm:$0xff]  ;;  %v1805_v18 = vld [vmem:[#allocation8 + $0x8] sm:$0xff] }
 0x657   :  { %1645 = vmatprep.subr.mxu0 %v3524_v3  ;;  %1716 = vmatprep.subr.mxu1 %v3525_v4  ;;  %v1804_v3 = vld [vmem:[#allocation8] sm:$0xff] }
 0x658   :  { %1646 = vmatpush1.msra.mxu0 %v3526_v6  ;;  %1717 = vmatpush1.msra.mxu1 %v3527_v8 }
 0x659   :  { %1647 = vmatprep.subr.mxu0 %v3528_v10  ;;  %1718 = vmatprep.subr.mxu1 %v3529_v11 }
 0x65a   :  { %1648 = vmatpush1.msra.mxu0 %v3530_v12  ;;  %1719 = vmatpush1.msra.mxu1 %v3531_v14 }
 0x65b   :  { %1649 = vmatprep.subr.mxu0 %v3532_v17  ;;  %1720 = vmatprep.subr.mxu1 %v3533_v19 }
 0x65c   :  { %1650 = vmatpush1.msra.mxu0 %v3534_v21  ;;  %1683 = vmatprep.mubr.f32.mxu0 %v3535_v22 }
 0x65d   :  { %1721 = vmatpush1.msra.mxu1 %v3536_v24  ;;  %1754 = vmatprep.mubr.f32.mxu1 %v3535_v22 }
 0x65e   :  { %1964 = vmatprep.subr.mxu0 %v3535_v22 }
 0x6fd   :  { %v1497_v25 = vpop.f32.mrf.mxu0  ;;  %v1568_v29 = vpop.f32.mrf.mxu1 }
 0x6fe   :  { %v1577_v26 = vrot.slane %v1497_v25, 4  ;;  %v1579_v40 = vrot.slane %v1568_v29, 4 }
 0x6ff   :  { %v1499_v27 = vpop.f32.mrf.mxu0  ;;  %v1570_v37 = vpop.f32.mrf.mxu1 }
 0x700   :  { %v1585_v28 = vadd.f32 %v1577_v26, %v3514_v1  ;;  %v1578_v30 = vrot.slane %v1499_v27, 4  ;;  %v1580_v38 = vrot.slane %v1570_v37, 4  ;;  %v1587_v43 = vadd.f32 %v1579_v40, %v3493_v63 }
 0x702   :  { %v1940_v31 = vmul.f32 -1.442695, %v1585_v28  ;;  %v1586_v33 = vadd.f32 %v1578_v30, %v3515_v56  ;;  %v1588_v39 = vadd.f32 %v1580_v38, %v3492_v48 }
 0x704   :  { %2106 = vpow2.f32 %v1940_v31  ;;  %v1941_v36 = vmul.f32 -1.442695, %v1586_v33  ;;  %v1942_v41 = vmul.f32 -1.442695, %v1588_v39 }
 0x706   :  { %2108 = vpow2.f32 %v1941_v36 }
 0x707   :  { %2110 = vpow2.f32 %v1942_v41 }
 0x711   :  { %v2107_v42 = vpop.eup %2106 }
 0x712   :  { %v1592_v45 = vadd.f32 1.0, %v2107_v42 }
 0x713   :  { %v2109_v47 = vpop.eup %2108 }
 0x714   :  { %2112 = vrcp.f32 %v1592_v45  ;;  %v1598_v49 = vadd.f32 1.0, %v2109_v47  ;;  %v2111_v51 = vpop.eup %2110  ;;  %v1946_v45 = vld [vmem:[%s3279_s5] ss:$0 sm:$0xff] }
 0x715   :  { %2114 = vtanh.f32 %v1587_v43  ;;  %v1605_v5 = vadd.f32 1.0, %v2111_v51 }
 0x716   :  { %2116 = vrcp.f32 %v1598_v49 }
 0x717   :  { %2118 = vrcp.f32 %v1605_v5 }
 0x721   :  { %v2113_v53 = vpop.eup %2112 }
 0x722   :  { %v2115_v52 = vpop.eup %2114 }
 0x723   :  { %v2117_v0 = vpop.eup %2116  ;;  %v1612_v7 = vmul.f32 %v2115_v52, %v2113_v53 }
 0x724   :  { %v1611_v13 = vmul.f32 %v2117_v0, %v1609_v20  ;;  %v2119_v54 = vpop.eup %2118 }
 0x726   :  { %v3244_v60 = vadd.f32 %v1612_v7, %v1611_v13 }
 0x728   :  { %2120 = vtanh.f32 %v3244_v60  ;;  %v1797_v36 = vrot.slane %v3244_v60, 6 }
 0x735   :  { %v2121_v35 = vpop.eup %2120 }
 0x736   :  { %v1615_v34 = vmul.f32 %v2121_v35, %v2119_v54 }
 0x738   :  { %v1617_v50 = vrot.slane %v1615_v34, 4 }
 0x73a   :  { %1684 = vmatmul.mubr.f32.vlgmr.msra.gmra.mxu0 %v1617_v50  ;;  %1755 = vmatmul.mubr.f32.vlgmr.msra.gmra.mxu1 %v1617_v50 }
 0x73b   :  { %1965 = vmatpush3.msra.mxu0 %v1819_v9  ;;  %1996 = vmatprep.mubr.msk.f32.mxu0 %vm2319_vm1, %v3535_v22 }
 0x73c   :  { %1966 = vmatprep.subr.mxu0 %v3535_v22 }
 0x73d   :  { %1967 = vmatpush3.msra.mxu0 %v1818_v32 }
 0x73e   :  { %1968 = vmatprep.subr.mxu0 %v3535_v22 }
 0x73f   :  { %1969 = vmatpush3.msra.mxu0 %v1817_v44 }
 0x740   :  { %1970 = vmatprep.subr.mxu0 %v3535_v22 }
 0x741   :  { %1971 = vmatpush3.msra.mxu0 %v1816_v61 }
 0x742   :  { %1972 = vmatprep.subr.mxu0 %v3535_v22 }
 0x743   :  { %1973 = vmatpush3.msra.mxu0 %v1815_v59 }
 0x744   :  { %1974 = vmatprep.subr.mxu0 %v3535_v22 }
 0x745   :  { %1975 = vmatpush3.msra.mxu0 %v1814_v57 }
 0x746   :  { %1976 = vmatprep.subr.mxu0 %v3535_v22 }
 0x747   :  { %1977 = vmatpush3.msra.mxu0 %v1813_v55 }
 0x748   :  { %1978 = vmatprep.subr.mxu0 %v3535_v22 }
 0x749   :  { %1979 = vmatpush3.msra.mxu0 %v1812_v16 }
 0x74a   :  { %1980 = vmatprep.subr.mxu0 %v3535_v22 }
 0x74b   :  { %1981 = vmatpush3.msra.mxu0 %v1811_v58 }
 0x74c   :  { %1982 = vmatprep.subr.mxu0 %v3535_v22 }
 0x74d   :  { %1983 = vmatpush3.msra.mxu0 %v1810_v15 }
 0x74e   :  { %1984 = vmatprep.subr.mxu0 %v3535_v22 }
 0x74f   :  { %1985 = vmatpush3.msra.mxu0 %v1809_v46 }
 0x750   :  { %1986 = vmatprep.subr.mxu0 %v3535_v22 }
 0x751   :  { %1987 = vmatpush3.msra.mxu0 %v1808_v62 }
 0x752   :  { %1988 = vmatprep.subr.mxu0 %v3535_v22 }
 0x753   :  { %1989 = vmatpush3.msra.mxu0 %v1807_v2 }
 0x754   :  { %1990 = vmatprep.subr.mxu0 %v3535_v22 }
 0x755   :  { %1991 = vmatpush3.msra.mxu0 %v1806_v23 }
 0x756   :  { %1992 = vmatprep.subr.mxu0 %v3535_v22 }
 0x757   :  { %1993 = vmatpush3.msra.mxu0 %v1805_v18 }
 0x758   :  { %1994 = vmatprep.subr.mxu0 %v3535_v22 }
 0x759   :  { %1995 = vmatpush3.msra.mxu0 %v1804_v3 }
 0x7fa   :  { %v1685_v4 = vpop.f32.mrf.mxu0  ;;  %v1756_v11 = vpop.f32.mrf.mxu1 }
 0x7fb   :  { %v1765_v6 = vrot.slane %v1685_v4, 2  ;;  %v1767_v26 = vrot.slane %v1756_v11, 2 }
 0x7fc   :  { %v1687_v8 = vpop.f32.mrf.mxu0  ;;  %v1758_v21 = vpop.f32.mrf.mxu1 }
 0x7fd   :  { %v1773_v10 = vadd.f32 %v1765_v6, %v3514_v1  ;;  %v1766_v12 = vrot.slane %v1687_v8, 2  ;;  %v1768_v24 = vrot.slane %v1758_v21, 2  ;;  %v1775_v28 = vadd.f32 %v1767_v26, %v3493_v63 }
 0x7ff   :  { %v1943_v14 = vmul.f32 -1.442695, %v1773_v10  ;;  %v1774_v17 = vadd.f32 %v1766_v12, %v3515_v56  ;;  %v1776_v25 = vadd.f32 %v1768_v24, %v3492_v48 }
 0x801   :  { %2122 = vpow2.f32 %v1943_v14  ;;  %v1944_v19 = vmul.f32 -1.442695, %v1774_v17  ;;  %v1945_v22 = vmul.f32 -1.442695, %v1776_v25 }
 0x803   :  { %2124 = vpow2.f32 %v1944_v19 }
 0x804   :  { %2126 = vpow2.f32 %v1945_v22 }
 0x80e   :  { %v2123_v27 = vpop.eup %2122 }
 0x80f   :  { %v1780_v29 = vadd.f32 1.0, %v2123_v27 }
 0x810   :  { %v2125_v30 = vpop.eup %2124 }
 0x811   :  { %2128 = vrcp.f32 %v1780_v29  ;;  %v1786_v1 = vadd.f32 1.0, %v2125_v30  ;;  %v2127_v56 = vpop.eup %2126 }
 0x812   :  { %2130 = vtanh.f32 %v1775_v28  ;;  %v1793_v38 = vadd.f32 1.0, %v2127_v56 }
 0x813   :  { %2132 = vrcp.f32 %v1786_v1 }
 0x814   :  { %2134 = vrcp.f32 %v1793_v38 }
 0x81e   :  { %v2129_v31 = vpop.eup %2128 }
 0x81f   :  { %v2131_v33 = vpop.eup %2130 }
 0x820   :  { %v2133_v37 = vpop.eup %2132  ;;  %v1800_v48 = vmul.f32 %v2131_v33, %v2129_v31 }
 0x821   :  { %v1799_v39 = vmul.f32 %v2133_v37, %v1797_v36  ;;  %v2135_v63 = vpop.eup %2134 }
 0x823   :  { %v1801_v40 = vadd.f32 %v1800_v48, %v1799_v39 }
 0x825   :  { %2136 = vtanh.f32 %v1801_v40 }
 0x832   :  { %v2137_v41 = vpop.eup %2136 }
 0x833   :  { %v1803_v42 = vmul.f32 %v2137_v41, %v2135_v63 }
 0x835   :  { %v1828_v43 = vrot.slane %v1803_v42, 6 }
 0x837   :  { %1997 = vmatmul.mubr.f32.vlgmr.msra.gmra.mxu0 %v1828_v43 }
 0x8f7   :  { %v1896_v47 = vpop.f32.mrf.mxu0 }
 0x8f8   :  { %v1897_v49 = vadd.f32 %v1946_v45, %v1896_v47 }
 0x8f9   :  { %v1998_v51 = vpop.f32.mrf.mxu0 }
 0x8fa   :  { %1900 = vst [vmem:[#allocation10] sm:$0x3] %v1897_v49 }
 0x8fb   :  { %2293 = shalt.err (!%p2290_p10)
}
 0x8fc   :  { %1910 = dma.vmem_to_hbm [thread:$0]  %s1908_s21, 32, %s3280_s6, [#allocation4]  }
 0x8fd   :  { %2308 = dma.done.wait [#allocation4], 32  }
 0x8fe   :  { %2309 = vsyncadd [#allocation4], 4294967264 }
 0x8ff   :  { %1914 = vsyncpa [#allocation3], 1 }
 0x900   :  { %1915 = vsyncpa [#allocation6], 1 }
 0x901   :  { %1916 = vsyncpa [#allocation9], 1 }
 0x902   :  { %1917 = vsyncpa [#allocation4], 1 }

</bundles_post_ra>
